<compile_context>
chip_gen: v5e
topology: v5e:2x2
jax: 0.10.0
libtpu: 0.0.40
codegen_flags: <defaults>
</compile_context>

<pallas_src>
import functools

import jax
import jax.numpy as jnp
from jax import lax
from jax.experimental import pallas as pl
from jax.experimental.pallas import tpu as pltpu

ACTION_SIZE = 4
RAY_BLOCKS = 7
RAY_BLOCK_SIZE = 5
VELOCITY_SIZE = 2
FC1_UNITS = 64
FC2_UNITS = 64

STATE_SIZE = RAY_BLOCKS * RAY_BLOCK_SIZE + VELOCITY_SIZE     # 37
HIDDEN_RAYS = RAY_BLOCKS * FC1_UNITS                         # 448
HIDDEN_AUG = HIDDEN_RAYS + 2 * VELOCITY_SIZE                 # 452 (+v / -v passthrough)

_DOT_PREC = lax.Precision.HIGHEST   # pinned: full-f32 MXU passes (see header note)


def _round_up(x, m):
    return (x + m - 1) // m * m


def qnet_kernel(state_ref, w1_ref, b1_ref, w2_ref, b2_ref, w3_ref, b3_ref, out_ref):
    """One batch tile of the full forward pass.

    state_ref : [TB, 37]   lane-dense state tile
    w1_ref    : [37, 452]  block-diag fc1 (x7) + (+I,-I) velocity passthrough
    b1_ref    : [1, 452]   tiled fc1 bias (zeros on the passthrough columns)
    w2_ref    : [452, 64]  fc2 rows: [w2_rays ; w2_vel ; -w2_vel]
    b2_ref    : [1, 64]
    w3_ref    : [64, 4]    fc3 (narrow output, no lane padding)
    b3_ref    : [1, 4]
    out_ref   : [TB, 4]
    """
    s = state_ref[...]

    # fc1 over all 7 ray chunks as one matmul; velocity rides through +/-I cols.
    h = jnp.dot(s, w1_ref[...], precision=_DOT_PREC,
                preferred_element_type=jnp.float32) + b1_ref[...]
    h = jnp.maximum(h, 0.0)                                        # [TB, 452]

    # fc2: single matmul over [relu(ray chunks), relu(+v), relu(-v)].
    x = jnp.dot(h, w2_ref[...], precision=_DOT_PREC,
                preferred_element_type=jnp.float32) + b2_ref[...]
    x = jnp.maximum(x, 0.0)                                        # [TB, 64]

    # fc3: narrow (4-lane) HBM-facing store.
    out_ref[...] = (jnp.dot(x, w3_ref[...], precision=_DOT_PREC,
                            preferred_element_type=jnp.float32) + b3_ref[...])


def init_params(seed=0):
    """Deterministic PyTorch-Linear-style init (uniform +-1/sqrt(fan_in)),
    weights stored as [in, out]."""
    key = jax.random.PRNGKey(seed)
    ks = jax.random.split(key, 6)

    def linear(kw, kb, fan_in, fan_out):
        bound = 1.0 / jnp.sqrt(float(fan_in))
        w = jax.random.uniform(kw, (fan_in, fan_out), jnp.float32, -bound, bound)
        b = jax.random.uniform(kb, (1, fan_out), jnp.float32, -bound, bound)
        return w, b

    w1, b1 = linear(ks[0], ks[1], RAY_BLOCK_SIZE, FC1_UNITS)
    w2, b2 = linear(ks[2], ks[3], HIDDEN_RAYS + VELOCITY_SIZE, FC2_UNITS)
    w3, b3 = linear(ks[4], ks[5], FC2_UNITS, ACTION_SIZE)
    return dict(w1=w1, b1=b1, w2=w2, b2=b2, w3=w3, b3=b3)


def _prepare_weights(params):
    """Wrapper-side weight restructuring (traced; folds into the jit graph)."""
    w1, b1 = params["w1"], params["b1"]           # [5, 64],  [1, 64]
    w2, b2 = params["w2"], params["b2"]           # [450, 64], [1, 64]
    w3, b3 = params["w3"], params["b3"]           # [64, 4],  [1, 4]
    dt = w1.dtype

    # Block-diagonal fc1 over the 7 ray chunks: [35, 448].
    w1_bd = jnp.einsum("ij,kl->ikjl", jnp.eye(RAY_BLOCKS, dtype=dt), w1)
    w1_bd = w1_bd.reshape(RAY_BLOCKS * RAY_BLOCK_SIZE, HIDDEN_RAYS)

    # Velocity passthrough columns: relu(+v) and relu(-v) reconstruct v exactly.
    ray_rows = jnp.concatenate(
        [w1_bd, jnp.zeros((RAY_BLOCKS * RAY_BLOCK_SIZE, 2 * VELOCITY_SIZE), dt)],
        axis=1)                                                    # [35, 452]
    eye_v = jnp.eye(VELOCITY_SIZE, dtype=dt)
    vel_rows = jnp.concatenate(
        [jnp.zeros((VELOCITY_SIZE, HIDDEN_RAYS), dt), eye_v, -eye_v], axis=1)  # [2, 452]
    w1_aug = jnp.concatenate([ray_rows, vel_rows], axis=0)         # [37, 452]
    b1_aug = jnp.concatenate(
        [jnp.tile(b1, (1, RAY_BLOCKS)),
         jnp.zeros((1, 2 * VELOCITY_SIZE), dt)], axis=1)           # [1, 452]

    # fc2 with velocity rows routed onto the +v / -v passthrough columns.
    w2v = w2[HIDDEN_RAYS:]                                         # [2, 64]
    w2_aug = jnp.concatenate([w2[:HIDDEN_RAYS], w2v, -w2v], axis=0)  # [452, 64]

    return w1_aug, b1_aug, w2_aug, b2, w3, b3


@functools.partial(jax.jit, static_argnames=("batch_tile",))
def qnetwork_forward(state, params, *, batch_tile=2048):
    """state: [B, 37] float32  ->  [B, ACTION_SIZE] float32."""
    B = state.shape[0]
    assert state.shape[1] == STATE_SIZE

    # Batch tiling: multiple of 8 sublanes.  Cap at ceil(B/2) for large B so the
    # "parallel" batch grid has >= 2 steps (v7x megacore gets both TCs busy).
    tb = min(batch_tile, _round_up(B, 8))
    half = _round_up(B, 16) // 2
    if half >= 1024:
        tb = min(tb, half)
    b_pad = _round_up(B, tb)
    if b_pad != B:
        state = jnp.pad(state, ((0, b_pad - B), (0, 0)))
    grid = (b_pad // tb,)

    w1_aug, b1_aug, w2_aug, b2, w3, b3 = _prepare_weights(params)

    def const_spec(shape):
        # Full-array block, resident across the batch grid (DMA'd once).
        return pl.BlockSpec(shape, lambda i: (0, 0))

    weight_bytes = 4 * (STATE_SIZE * HIDDEN_AUG + HIDDEN_AUG
                        + HIDDEN_AUG * FC2_UNITS + FC2_UNITS
                        + FC2_UNITS * ACTION_SIZE + ACTION_SIZE)
    cost = pl.CostEstimate(
        flops=2 * b_pad * (STATE_SIZE * HIDDEN_AUG + HIDDEN_AUG * FC2_UNITS
                           + FC2_UNITS * ACTION_SIZE),
        transcendentals=0,
        bytes_accessed=4 * b_pad * (STATE_SIZE + ACTION_SIZE) + weight_bytes,
    )

    out = pl.pallas_call(
        qnet_kernel,
        out_shape=jax.ShapeDtypeStruct((b_pad, ACTION_SIZE), jnp.float32),
        grid=grid,
        in_specs=[
            pl.BlockSpec((tb, STATE_SIZE), lambda i: (i, 0)),      # state tile
            const_spec((STATE_SIZE, HIDDEN_AUG)),                  # w1_aug
            const_spec((1, HIDDEN_AUG)),                           # b1_aug
            const_spec((HIDDEN_AUG, FC2_UNITS)),                   # w2_aug
            const_spec((1, FC2_UNITS)),                            # b2
            const_spec((FC2_UNITS, ACTION_SIZE)),                  # w3
            const_spec((1, ACTION_SIZE)),                          # b3
        ],
        out_specs=pl.BlockSpec((tb, ACTION_SIZE), lambda i: (i, 0)),
        compiler_params=pltpu.CompilerParams(
            dimension_semantics=("parallel",),
            vmem_limit_bytes=32 * 1024 * 1024),
        cost_estimate=cost,
    )(state, w1_aug, b1_aug, w2_aug, b2, w3, b3)

    return out[:B]


def qnetwork_reference(state, params):
    """Pure-JAX reference mirroring the PyTorch forward (precision pinned)."""
    p = _DOT_PREC
    chunks = [state[:, i * RAY_BLOCK_SIZE:(i + 1) * RAY_BLOCK_SIZE]
              for i in range(RAY_BLOCKS)]
    vel = state[:, RAY_BLOCKS * RAY_BLOCK_SIZE:]
    transformed = [jnp.maximum(jnp.dot(c, params["w1"], precision=p) + params["b1"], 0.0)
                   for c in chunks]
    reduced = jnp.concatenate(transformed + [vel], axis=1)
    x = jnp.maximum(jnp.dot(reduced, params["w2"], precision=p) + params["b2"], 0.0)
    return jnp.dot(x, params["w3"], precision=p) + params["b3"]


if __name__ == "__main__":
    B = 2
    key = jax.random.PRNGKey(0)
    state = jax.random.normal(key, (B, STATE_SIZE), dtype=jnp.float32)

    params = init_params(seed=0)

    out = qnetwork_forward(state, params)
    out = jax.block_until_ready(out)

    ref = qnetwork_reference(state, params)
    assert out.shape == (B, ACTION_SIZE)
    assert jnp.allclose(out, ref, atol=1e-4, rtol=1e-4), "mismatch vs. reference"

    print("KERNEL_OK")
</pallas_src>

<mosaic_0001>
module attributes {stable_mosaic.version = 11 : i64} {
  func.func @qnet_kernel(%arg0: i32, %arg1: memref<8x37xf32, #tpu.memory_space<vmem>>, %arg2: memref<37x452xf32, #tpu.memory_space<vmem>>, %arg3: memref<1x452xf32, #tpu.memory_space<vmem>>, %arg4: memref<452x64xf32, #tpu.memory_space<vmem>>, %arg5: memref<1x64xf32, #tpu.memory_space<vmem>>, %arg6: memref<64x4xf32, #tpu.memory_space<vmem>>, %arg7: memref<1x4xf32, #tpu.memory_space<vmem>>, %arg8: memref<8x4xf32, #tpu.memory_space<vmem>>) attributes {dimension_semantics = [#tpu.dimension_semantics<parallel>], iteration_bounds = array<i64: 1>, scalar_prefetch = 0 : i64, scratch_operands = 0 : i64, tpu.core_type = #tpu.core_type<tc>, window_params = [{transform_indices = @transform_0, window_bounds = array<i64: 8, 37>}, {pipeline_mode = #tpu.pipeline_mode<synchronous>, transform_indices = @transform_1, window_bounds = array<i64: 37, 452>}, {pipeline_mode = #tpu.pipeline_mode<synchronous>, transform_indices = @transform_2, window_bounds = array<i64: 1, 452>}, {pipeline_mode = #tpu.pipeline_mode<synchronous>, transform_indices = @transform_3, window_bounds = array<i64: 452, 64>}, {pipeline_mode = #tpu.pipeline_mode<synchronous>, transform_indices = @transform_4, window_bounds = array<i64: 1, 64>}, {pipeline_mode = #tpu.pipeline_mode<synchronous>, transform_indices = @transform_5, window_bounds = array<i64: 64, 4>}, {pipeline_mode = #tpu.pipeline_mode<synchronous>, transform_indices = @transform_6, window_bounds = array<i64: 1, 4>}, {transform_indices = @transform_7, window_bounds = array<i64: 8, 4>}]} {
    %c0 = arith.constant 0 : index
    %c0_0 = arith.constant 0 : index
    %0 = vector.load %arg1[%c0, %c0_0] : memref<8x37xf32, #tpu.memory_space<vmem>>, vector<8x37xf32>
    %c0_1 = arith.constant 0 : index
    %c0_2 = arith.constant 0 : index
    %1 = vector.load %arg2[%c0_1, %c0_2] : memref<37x452xf32, #tpu.memory_space<vmem>>, vector<37x452xf32>
    %cst = arith.constant dense<0.000000e+00> : vector<8x452xf32>
    %2 = tpu.matmul %0, %1, %cst {dimension_numbers = #tpu.dot_dimension_numbers<[1], [0], [0], [1], [0, 0, 1, 1], [], []>, precision = #tpu.contract_precision<fp32>} : vector<8x37xf32>, vector<37x452xf32>, vector<8x452xf32> -> vector<8x452xf32>
    %c0_3 = arith.constant 0 : index
    %c0_4 = arith.constant 0 : index
    %3 = vector.load %arg3[%c0_3, %c0_4] : memref<1x452xf32, #tpu.memory_space<vmem>>, vector<1x452xf32>
    %4 = vector.broadcast %3 : vector<1x452xf32> to vector<8x452xf32>
    %5 = arith.addf %2, %4 : vector<8x452xf32>
    %cst_5 = arith.constant 0.000000e+00 : f32
    %6 = vector.broadcast %cst_5 : f32 to vector<8x452xf32>
    %7 = arith.maximumf %5, %6 : vector<8x452xf32>
    %c0_6 = arith.constant 0 : index
    %c0_7 = arith.constant 0 : index
    %8 = vector.load %arg4[%c0_6, %c0_7] : memref<452x64xf32, #tpu.memory_space<vmem>>, vector<452x64xf32>
    %cst_8 = arith.constant dense<0.000000e+00> : vector<8x64xf32>
    %9 = tpu.matmul %7, %8, %cst_8 {dimension_numbers = #tpu.dot_dimension_numbers<[1], [0], [0], [1], [0, 0, 1, 1], [], []>, precision = #tpu.contract_precision<fp32>} : vector<8x452xf32>, vector<452x64xf32>, vector<8x64xf32> -> vector<8x64xf32>
    %c0_9 = arith.constant 0 : index
    %c0_10 = arith.constant 0 : index
    %10 = vector.load %arg5[%c0_9, %c0_10] : memref<1x64xf32, #tpu.memory_space<vmem>>, vector<1x64xf32>
    %11 = vector.broadcast %10 : vector<1x64xf32> to vector<8x64xf32>
    %12 = arith.addf %9, %11 : vector<8x64xf32>
    %cst_11 = arith.constant 0.000000e+00 : f32
    %13 = vector.broadcast %cst_11 : f32 to vector<8x64xf32>
    %14 = arith.maximumf %12, %13 : vector<8x64xf32>
    %c0_12 = arith.constant 0 : index
    %c0_13 = arith.constant 0 : index
    %15 = vector.load %arg6[%c0_12, %c0_13] : memref<64x4xf32, #tpu.memory_space<vmem>>, vector<64x4xf32>
    %cst_14 = arith.constant dense<0.000000e+00> : vector<8x4xf32>
    %16 = tpu.matmul %14, %15, %cst_14 {dimension_numbers = #tpu.dot_dimension_numbers<[1], [0], [0], [1], [0, 0, 1, 1], [], []>, precision = #tpu.contract_precision<fp32>} : vector<8x64xf32>, vector<64x4xf32>, vector<8x4xf32> -> vector<8x4xf32>
    %c0_15 = arith.constant 0 : index
    %c0_16 = arith.constant 0 : index
    %17 = vector.load %arg7[%c0_15, %c0_16] : memref<1x4xf32, #tpu.memory_space<vmem>>, vector<1x4xf32>
    %18 = vector.broadcast %17 : vector<1x4xf32> to vector<8x4xf32>
    %19 = arith.addf %16, %18 : vector<8x4xf32>
    %c0_17 = arith.constant 0 : index
    %c0_18 = arith.constant 0 : index
    %20 = vector.load %arg8[%c0_17, %c0_18] : memref<8x4xf32, #tpu.memory_space<vmem>>, vector<8x4xf32>
    tpu.vector_store %arg8[%c0_17, %c0_18], %19 {strides = array<i32>} : memref<8x4xf32, #tpu.memory_space<vmem>>, vector<8x4xf32>,
    return
  }
  func.func @transform_0(%arg0: i32) -> (i32, i32) {
    %c0_i32 = arith.constant 0 : i32
    %c0_i32_0 = arith.constant 0 : i32
    return %arg0, %c0_i32 : i32, i32
  }
  func.func @transform_1(%arg0: i32) -> (i32, i32) {
    %c0_i32 = arith.constant 0 : i32
    %c0_i32_0 = arith.constant 0 : i32
    %c0_i32_1 = arith.constant 0 : i32
    return %c0_i32, %c0_i32_0 : i32, i32
  }
  func.func @transform_2(%arg0: i32) -> (i32, i32) {
    %c0_i32 = arith.constant 0 : i32
    %c0_i32_0 = arith.constant 0 : i32
    %c0_i32_1 = arith.constant 0 : i32
    return %c0_i32, %c0_i32_0 : i32, i32
  }
  func.func @transform_3(%arg0: i32) -> (i32, i32) {
    %c0_i32 = arith.constant 0 : i32
    %c0_i32_0 = arith.constant 0 : i32
    %c0_i32_1 = arith.constant 0 : i32
    return %c0_i32, %c0_i32_0 : i32, i32
  }
  func.func @transform_4(%arg0: i32) -> (i32, i32) {
    %c0_i32 = arith.constant 0 : i32
    %c0_i32_0 = arith.constant 0 : i32
    %c0_i32_1 = arith.constant 0 : i32
    return %c0_i32, %c0_i32_0 : i32, i32
  }
  func.func @transform_5(%arg0: i32) -> (i32, i32) {
    %c0_i32 = arith.constant 0 : i32
    %c0_i32_0 = arith.constant 0 : i32
    %c0_i32_1 = arith.constant 0 : i32
    return %c0_i32, %c0_i32_0 : i32, i32
  }
  func.func @transform_6(%arg0: i32) -> (i32, i32) {
    %c0_i32 = arith.constant 0 : i32
    %c0_i32_0 = arith.constant 0 : i32
    %c0_i32_1 = arith.constant 0 : i32
    return %c0_i32, %c0_i32_0 : i32, i32
  }
  func.func @transform_7(%arg0: i32) -> (i32, i32) {
    %c0_i32 = arith.constant 0 : i32
    %c0_i32_0 = arith.constant 0 : i32
    return %arg0, %c0_i32 : i32, i32
  }
}

</mosaic_0001>

<bundles_post_ra>
// kernel: qnetwork_forward.1
= control target key start
LH: loop header
LB: loop body
LE: loop exit
PB: predicated region body
PF: predicated region fallthrough
CT: control target
= control target key end

     0   :  { %vm61_vm0 = vcmask 1044480   ;;  %vm57_vm1 = vcmask 302080   ;;  %vm935_vm2 = vcmask 1043456   ;;  %vm931_vm3 = vcmask 556032   ;;  %s4082_s1 = inlined_call_operand.vmem [shape: f32[37,452], index: 1, kind: input, shape index: {}]   ;;  %s4083_s0 = inlined_call_operand.vmem [shape: f32[8,37], index: 0, kind: input, shape index: {}]   ;;  %s4084_s3 = inlined_call_operand.vmem [shape: f32[452,64], index: 3, kind: input, shape index: {}]   ;;  %s4085_s2 = inlined_call_operand.vmem [shape: f32[1,452], index: 2, kind: input, shape index: {}]   ;;  %s4086_s4 = inlined_call_operand.vmem [shape: f32[1,64], index: 4, kind: input, shape index: {}]   ;;  %s4087_s5 = inlined_call_operand.vmem [shape: f32[64,4], index: 5, kind: input, shape index: {}]   ;;  %s4088_s6 = inlined_call_operand.vmem [shape: f32[1,4], index: 6, kind: input, shape index: {}]   ;;  %s4089_s7 = inlined_call_operand.vmem [shape: f32[8,4], index: 7, kind: output, shape index: {}]  }
   0x1   :  { %v43_v0 = vld [vmem:[%s4082_s1 + $0x80] sm:$0x1f]  ;;  %v44_v12 = vld [vmem:[%s4082_s1 + $0x88] sm:$0x1f]  ;;  %vm2225_vm4 = vcmask 523264   ;;  %vm2466_vm5 = vcmask 31744  }
   0x2   :  { %v39_v1 = vld [vmem:[%s4082_s1 + $0x60] sm:$0xff]  ;;  %v63_v3 = vsel %vm61_vm0, %v43_v0, 0  ;;  %v66_v16 = vsel %vm61_vm0, %v44_v12, 0  ;;  %v40_v18 = vld [vmem:[%s4082_s1 + $0x68] sm:$0xff]  ;;  %v45_v0 = vld [vmem:[%s4082_s1 + $0x90] sm:$0x1f] }
   0x3   :  { %v35_v2 = vld [vmem:[%s4082_s1 + $0x40] sm:$0xff]  ;;  %v2524_v4 = vand.u32 4294901760, %v39_v1  ;;  %v2537_v9 = vand.u32 4294901760, %v63_v3  ;;  %v2567_v22 = vand.u32 4294901760, %v66_v16  ;;  %v36_v23 = vld [vmem:[%s4082_s1 + $0x48] sm:$0xff]  ;;  %v2577_v27 = vand.u32 4294901760, %v40_v18 }
   0x4   :  { %v2526_v5 = vand.u32 4294901760, %v35_v2  ;;  %v31_v6 = vld [vmem:[%s4082_s1 + $0x20] sm:$0xff]  ;;  %v2591_v33 = vand.u32 4294901760, %v36_v23  ;;  %v32_v38 = vld [vmem:[%s4082_s1 + $0x28] sm:$0xff] }
   0x5   :  { %v27_v7 = vld [vmem:[%s4082_s1] sm:$0xff]  ;;  %v2539_v10 = vand.u32 4294901760, %v31_v6  ;;  %v2547_v14 = vsub.f32 %v39_v1, %v2524_v4  ;;  %v116_v19 = vsub.f32 %v63_v3, %v2537_v9  ;;  %86 = vmatpush.msra.mxu0 %v2537_v9  ;;  %194 = vmatpush.msra.mxu3 %v2537_v9  ;;  %v2582_v30 = vsub.f32 %v66_v16, %v2567_v22  ;;  %v28_v41 = vld [vmem:[%s4082_s1 + $0x8] sm:$0xff] }
   0x6   :  { %v26_v8 = vld [vmem:[%s4083_s0] sm:$0xff]  ;;  %v2541_v11 = vand.u32 4294901760, %v27_v7  ;;  %v2550_v15 = vsub.f32 %v35_v2, %v2526_v5  ;;  %v2608_v40 = vsub.f32 %v40_v18, %v2577_v27  ;;  %v2622_v47 = vand.u32 4294901760, %v32_v38 }
   0x7   :  { %v59_v13 = vsel %vm57_vm1, %v26_v8, 0  ;;  %v2562_v20 = vsub.f32 %v31_v6, %v2539_v10  ;;  %v123_v24 = vand.u32 4294901760, %v2547_v14  ;;  %163 = vmatpush.msra.mxu2 %v116_v19  ;;  %88 = vmatpush.msra.mxu0 %v2524_v4  ;;  %v117_v28 = vand.u32 4294901760, %v116_v19  ;;  %v41_v8 = vld [vmem:[%s4082_s1 + $0x70] sm:$0xff] }
   0x8   :  { %v2553_v17 = vand.u32 4294901760, %v59_v13  ;;  %v2565_v21 = vsub.f32 %v27_v7, %v2541_v11  ;;  %v129_v25 = vand.u32 4294901760, %v2550_v15  ;;  %196 = vmatpush.msra.mxu3 %v2524_v4  ;;  %v315_v36 = vand.u32 4294901760, %v2582_v30 }
   0x9   :  { %v135_v29 = vand.u32 4294901760, %v2562_v20  ;;  %v124_v31 = vsub.f32 %v2547_v14, %v123_v24  ;;  %166 = vmatpush.msra.mxu2 %v2547_v14  ;;  %v118_v34 = vsub.f32 %v116_v19, %v117_v28  ;;  %90 = vmatpush.msra.mxu0 %v2526_v5  ;;  %v321_v46 = vand.u32 4294901760, %v2608_v40 }
   0xa   :  { %v2575_v26 = vsub.f32 %v59_v13, %v2553_v17  ;;  %v130_v35 = vsub.f32 %v2550_v15, %v129_v25  ;;  %v141_v37 = vand.u32 4294901760, %v2565_v21  ;;  %198 = vmatpush.msra.mxu3 %v2526_v5  ;;  %v316_v44 = vsub.f32 %v2582_v30, %v315_v36  ;;  %v37_v13 = vld [vmem:[%s4082_s1 + $0x50] sm:$0xff] }
   0xb   :  { %v136_v39 = vsub.f32 %v2562_v20, %v135_v29  ;;  %v119_v42 = vand.u32 4294901760, %v118_v34  ;;  %169 = vmatpush.msra.mxu2 %v2550_v15  ;;  %v125_v43 = vand.u32 4294901760, %v124_v31  ;;  %92 = vmatpush.msra.mxu0 %v2539_v10  ;;  %v2625_v48 = vsub.f32 %v36_v23, %v2591_v33 }
   0xc   :  { %v2589_v32 = vand.u32 4294901760, %v2575_v26  ;;  %200 = vmatpush.msra.mxu3 %v2539_v10  ;;  %v131_v49 = vand.u32 4294901760, %v130_v35  ;;  %v142_v50 = vsub.f32 %v2565_v21, %v141_v37  ;;  %v2631_v51 = vand.u32 4294901760, %v28_v41  ;;  %v38_v35 = vld [vmem:[%s4082_s1 + $0x58] sm:$0xff] }
   0xd   :  { %120 = vmatpush.msra.mxu1 %v119_v42  ;;  %172 = vmatpush.msra.mxu2 %v2562_v20  ;;  %v317_v52 = vand.u32 4294901760, %v316_v44  ;;  %v322_v53 = vsub.f32 %v2608_v40, %v321_v46  ;;  %v327_v54 = vand.u32 4294901760, %v2625_v48  ;;  %v2640_v55 = vsub.f32 %v32_v38, %v2622_v47 }
   0xe   :  { %v98_v45 = vsub.f32 %v2575_v26, %v2589_v32  ;;  %94 = vmatpush.msra.mxu0 %v2541_v11  ;;  %202 = vmatpush.msra.mxu3 %v2541_v11  ;;  %v137_v56 = vand.u32 4294901760, %v136_v39  ;;  %v2646_v58 = vsub.f32 %v28_v41, %v2631_v51  ;;  %v143_v60 = vand.u32 4294901760, %v142_v50 }
   0xf   :  { %126 = vmatpush.msra.mxu1 %v125_v43  ;;  %175 = vmatpush.msra.mxu2 %v2565_v21  ;;  %v333_v59 = vand.u32 4294901760, %v2640_v55  ;;  %v328_v61 = vsub.f32 %v2625_v48, %v327_v54  ;;  %v323_v63 = vand.u32 4294901760, %v322_v53  ;;  %v69_v6 = vsel %vm61_vm0, %v45_v0, 0  ;;  %v46_v21 = vld [vmem:[%s4082_s1 + $0x98] sm:$0x1f] }
  0x10   :  { %v2643_v57 = vand.u32 4294901760, %v98_v45  ;;  %224 = vmatpush.msrb.mxu0 %v117_v28  ;;  %178 = vmatmul.f32.vlgmr.msra.gmra.mxu2 %v2575_v26  ;;  %v339_v62 = vand.u32 4294901760, %v2646_v58  ;;  %v2680_v12 = vand.u32 4294901760, %v69_v6  ;;  %v2689_v14 = vand.u32 4294901760, %v41_v8  ;;  %v34_v43 = vld [vmem:[%s4082_s1 + $0x38] sm:$0xff] }
  0x11   :  { %284 = vmatpush.msrb.mxu2 %v2567_v22  ;;  %132 = vmatpush.msra.mxu1 %v131_v49  ;;  %v334_v1 = vsub.f32 %v2640_v55, %v333_v59  ;;  %v329_v2 = vand.u32 4294901760, %v328_v61  ;;  %v2788_v42 = vand.u32 4294901760, %v38_v35  ;;  %v885_v61 = vld [vmem:[%s4084_s3 + $0x78] sm:$0xff] }
  0x12   :  { %318 = vmatpush.msrb.mxu3 %v317_v52  ;;  %100 = vmatmul.f32.vlgmr.msra.gmra.mxu0 %v2643_v57  ;;  %v340_v3 = vsub.f32 %v2646_v58, %v339_v62  ;;  %v2700_v15 = vsub.f32 %v69_v6, %v2680_v12  ;;  %v2709_v16 = vsub.f32 %v41_v8, %v2689_v14 }
  0x13   :  { %286 = vmatpush.msrb.mxu2 %v2577_v27  ;;  %138 = vmatpush.msra.mxu1 %v137_v56  ;;  %v335_v7 = vand.u32 4294901760, %v334_v1  ;;  %v884_v1 = vld [vmem:[%s4084_s3 + $0x70] sm:$0xff] }
  0x14   :  { %206 = vmatmul.f32.vlgmr.msra.gmra.mxu3 %v2589_v32  ;;  %228 = vmatpush.msrb.mxu0 %v123_v24  ;;  %v513_v19 = vand.u32 4294901760, %v2700_v15 }
  0x15   :  { %144 = vmatpush.msra.mxu1 %v143_v60  ;;  %288 = vmatpush.msrb.mxu2 %v2591_v33 }
  0x16   :  { %324 = vmatpush.msrb.mxu3 %v323_v63  ;;  %146 = vmatmul.f32.vlgmr.msra.gmra.mxu1 %v2553_v17 }
  0x17   :  { %258 = vmatpush.msrb.mxu1 %v2537_v9  ;;  %232 = vmatpush.msrb.mxu0 %v129_v25  ;;  %v341_v9 = vand.u32 4294901760, %v340_v3  ;;  %v72_v25 = vsel %vm61_vm0, %v46_v21, 0  ;;  %v2857_v3 = vand.u32 4294901760, %v885_v61 }
  0x18   :  { %290 = vmatpush.msrb.mxu2 %v2622_v47  ;;  %330 = vmatpush.msrb.mxu3 %v329_v2  ;;  %v2763_v34 = vand.u32 4294901760, %v72_v25 }
  0x19   :  { %260 = vmatpush.msrb.mxu1 %v2524_v4  ;;  %236 = vmatpush.msrb.mxu0 %v135_v29  ;;  %v33_v4 = vld [vmem:[%s4082_s1 + $0x30] sm:$0xff] }
  0x1a   :  { %292 = vmatpush.msrb.mxu2 %v2631_v51  ;;  %336 = vmatpush.msrb.mxu3 %v335_v7  ;;  %v2711_v18 = vand.u32 4294901760, %v33_v4  ;;  %v2786_v41 = vsub.f32 %v72_v25, %v2763_v34  ;;  %v883_v7 = vld [vmem:[%s4084_s3 + $0x68] sm:$0xff] }
  0x1b   :  { %262 = vmatpush.msrb.mxu1 %v2526_v5  ;;  %240 = vmatpush.msrb.mxu0 %v141_v37  ;;  %v2702_v5 = vand.u32 4294901760, %v37_v13 }
  0x1c   :  { %422 = vmatpush.msra.mxu2 %v315_v36  ;;  %342 = vmatpush.msrb.mxu3 %v341_v9  ;;  %v2736_v24 = vsub.f32 %v33_v4, %v2711_v18  ;;  %v711_v50 = vand.u32 4294901760, %v2786_v41  ;;  %v2882_v4 = vand.u32 4294901760, %v883_v7 }
  0x1d   :  { %264 = vmatpush.msrb.mxu1 %v2539_v10  ;;  %298 = vmatmul.f32.vlgmr.msrb.gmra.mxu2 %v2643_v57  ;;  %v29_v10 = vld [vmem:[%s4082_s1 + $0x10] sm:$0xff]  ;;  %v2722_v20 = vsub.f32 %v37_v13, %v2702_v5 }
  0x1e   :  { %242 = vmatmul.f32.vlgmr.msrb.gmra.mxu0 %v2553_v17  ;;  %426 = vmatpush.msra.mxu2 %v321_v46  ;;  %v2729_v23 = vand.u32 4294901760, %v29_v10  ;;  %v531_v31 = vand.u32 4294901760, %v2736_v24  ;;  %v30_v46 = vld [vmem:[%s4082_s1 + $0x18] sm:$0xff]  ;;  %v712_v56 = vsub.f32 %v2786_v41, %v711_v50  ;;  %v2905_v21 = vsub.f32 %v883_v7, %v2882_v4 }
  0x1f   :  { %361 = vmatpush.msra.mxu0 %v2582_v30  ;;  %456 = vmatpush.msra.mxu3 %v2567_v22  ;;  %v525_v28 = vand.u32 4294901760, %v2722_v20  ;;  %v2816_v52 = vand.u32 4294901760, %v30_v46 }
  0x20   :  { %266 = vmatpush.msrb.mxu1 %v2541_v11  ;;  %344 = vmatmul.f32.vlgmr.msrb.gmra.mxu3 %v2553_v17  ;;  %v519_v11 = vand.u32 4294901760, %v2709_v16  ;;  %v2751_v29 = vsub.f32 %v29_v10, %v2729_v23  ;;  %v713_v63 = vand.u32 4294901760, %v712_v56  ;;  %v881_v10 = vld [vmem:[%s4084_s3 + $0x58] sm:$0xff] }
  0x21   :  { %268 = vmatmul.f32.vlgmr.msrb.gmra.mxu1 %v2553_v17  ;;  %364 = vmatpush.msra.mxu0 %v2608_v40  ;;  %v526_v36 = vsub.f32 %v2722_v20, %v525_v28  ;;  %v532_v40 = vsub.f32 %v2736_v24, %v531_v31 }
  0x22   :  { %392 = vmatpush.msra.mxu1 %v2567_v22  ;;  %430 = vmatpush.msra.mxu2 %v327_v54  ;;  %v514_v22 = vsub.f32 %v2700_v15, %v513_v19  ;;  %v520_v30 = vsub.f32 %v2709_v16, %v519_v11  ;;  %v537_v38 = vand.u32 4294901760, %v2751_v29 }
  0x23   :  { %458 = vmatpush.msra.mxu3 %v2577_v27  ;;  %367 = vmatpush.msra.mxu0 %v2625_v48  ;;  %v527_v44 = vand.u32 4294901760, %v526_v36  ;;  %v2807_v48 = vand.u32 4294901760, %v34_v43  ;;  %v533_v49 = vand.u32 4294901760, %v532_v40 }
  0x24   :  { %394 = vmatpush.msra.mxu1 %v2577_v27  ;;  %434 = vmatpush.msra.mxu2 %v333_v59  ;;  %v42_v27 = vld [vmem:[%s4082_s1 + $0x78] sm:$0xff]  ;;  %v521_v39 = vand.u32 4294901760, %v520_v30  ;;  %v2833_v59 = vsub.f32 %v30_v46, %v2816_v52  ;;  %v994_v30 = vand.u32 4294901760, %v2905_v21 }
  0x25   :  { %460 = vmatpush.msra.mxu3 %v2591_v33  ;;  %370 = vmatpush.msra.mxu0 %v2640_v55  ;;  %v2775_v37 = vand.u32 4294901760, %v42_v27  ;;  %v2823_v55 = vsub.f32 %v34_v43, %v2807_v48 }
  0x26   :  { %396 = vmatpush.msra.mxu1 %v2591_v33  ;;  %438 = vmatpush.msra.mxu2 %v339_v62  ;;  %v515_v33 = vand.u32 4294901760, %v514_v22  ;;  %v735_v2 = vand.u32 4294901760, %v2833_v59  ;;  %v995_v40 = vsub.f32 %v2905_v21, %v994_v30 }
  0x27   :  { %462 = vmatpush.msra.mxu3 %v2622_v47  ;;  %440 = vmatmul.f32.vlgmr.msra.gmra.mxu2 %v2553_v17  ;;  %v2797_v45 = vsub.f32 %v42_v27, %v2775_v37  ;;  %v729_v62 = vand.u32 4294901760, %v2823_v55 }
  0x28   :  { %373 = vmatpush.msra.mxu0 %v2646_v58  ;;  %398 = vmatpush.msra.mxu1 %v2622_v47  ;;  %v538_v47 = vsub.f32 %v2751_v29, %v537_v38  ;;  %v736_v13 = vsub.f32 %v2833_v59, %v735_v2 }
  0x29   :  { %464 = vmatpush.msra.mxu3 %v2631_v51  ;;  %376 = vmatmul.f32.vlgmr.msra.gmra.mxu0 %v2575_v26  ;;  %v717_v53 = vand.u32 4294901760, %v2797_v45  ;;  %v730_v8 = vsub.f32 %v2823_v55, %v729_v62 }
  0x2a   :  { %466 = vmatmul.f32.vlgmr.msra.gmra.mxu3 %v2553_v17  ;;  %400 = vmatpush.msra.mxu1 %v2631_v51  ;;  %v2812_v51 = vsub.f32 %v38_v35, %v2788_v42  ;;  %v539_v54 = vand.u32 4294901760, %v538_v47 }
  0x2b   :  { %404 = vmatmul.f32.vlgmr.msra.gmra.mxu1 %v2589_v32  ;;  %559 = vmatpush.msrb.mxu2 %v2700_v15  ;;  %v718_v60 = vsub.f32 %v2797_v45, %v717_v53  ;;  %v882_v15 = vld [vmem:[%s4084_s3 + $0x60] sm:$0xff] }
  0x2c   :  { %482 = vmatpush.msrb.mxu0 %v2680_v12  ;;  %516 = vmatpush.msrb.mxu1 %v515_v33  ;;  %v723_v58 = vand.u32 4294901760, %v2812_v51 }
  0x2d   :  { %562 = vmatpush.msrb.mxu2 %v2709_v16  ;;  %590 = vmatpush.msrb.mxu3 %v2680_v12  ;;  %v719_v6 = vand.u32 4294901760, %v718_v60 }
  0x2e   :  { %484 = vmatpush.msrb.mxu0 %v2689_v14  ;;  %522 = vmatpush.msrb.mxu1 %v521_v39  ;;  %v724_v0 = vsub.f32 %v2812_v51, %v723_v58 }
  0x2f   :  { %565 = vmatpush.msrb.mxu2 %v2722_v20  ;;  %592 = vmatpush.msrb.mxu3 %v2689_v14 }
  0x30   :  { %486 = vmatpush.msrb.mxu0 %v2702_v5  ;;  %528 = vmatpush.msrb.mxu1 %v527_v44  ;;  %v725_v9 = vand.u32 4294901760, %v724_v0 }
  0x31   :  { %568 = vmatpush.msrb.mxu2 %v2736_v24  ;;  %594 = vmatpush.msrb.mxu3 %v2702_v5  ;;  %v2912_v24 = vand.u32 4294901760, %v881_v10 }
  0x32   :  { %488 = vmatpush.msrb.mxu0 %v2711_v18  ;;  %534 = vmatpush.msrb.mxu1 %v533_v49 }
  0x33   :  { %571 = vmatpush.msrb.mxu2 %v2751_v29  ;;  %596 = vmatpush.msrb.mxu3 %v2711_v18  ;;  %v878_v29 = vld [vmem:[%s4084_s3 + $0x40] sm:$0xff]  ;;  %v2940_v35 = vsub.f32 %v881_v10, %v2912_v24 }
  0x34   :  { %490 = vmatpush.msrb.mxu0 %v2729_v23  ;;  %574 = vmatmul.f32.vlgmr.msrb.gmra.mxu2 %v2575_v26  ;;  %v2948_v36 = vand.u32 4294901760, %v878_v29  ;;  %v870_v10 = vld [vmem:[%s4084_s3] sm:$0xff] }
  0x35   :  { %540 = vmatpush.msrb.mxu1 %v539_v54  ;;  %598 = vmatpush.msrb.mxu3 %v2729_v23  ;;  %v1006_v44 = vand.u32 4294901760, %v2940_v35  ;;  %v996_v54 = vand.u32 4294901760, %v995_v40 }
  0x36   :  { %620 = vmatpush.msra.mxu0 %v513_v19  ;;  %602 = vmatmul.f32.vlgmr.msrb.gmra.mxu3 %v2589_v32  ;;  %v2899_v19 = vand.u32 4294901760, %v882_v15  ;;  %v2980_v49 = vsub.f32 %v878_v29, %v2948_v36 }
  0x37   :  { %496 = vmatmul.f32.vlgmr.msrb.gmra.mxu0 %v2643_v57  ;;  %654 = vmatpush.msra.mxu1 %v2680_v12  ;;  %v2870_v12 = vand.u32 4294901760, %v884_v1 }
  0x38   :  { %624 = vmatpush.msra.mxu0 %v519_v11  ;;  %542 = vmatmul.f32.vlgmr.msrb.gmra.mxu1 %v2553_v17  ;;  %v880_v11 = vld [vmem:[%s4084_s3 + $0x50] sm:$0xff]  ;;  %v2922_v22 = vsub.f32 %v882_v15, %v2899_v19 }
  0x39   :  { %656 = vmatpush.msra.mxu1 %v2689_v14  ;;  %680 = vmatpush.msra.mxu2 %v2763_v34  ;;  %v2880_v14 = vsub.f32 %v885_v61, %v2857_v3  ;;  %v2892_v16 = vsub.f32 %v884_v1, %v2870_v12  ;;  %v4103_v61 = vand.u32 4294901760, %v2980_v49 }
  0x3a   :  { %628 = vmatpush.msra.mxu0 %v525_v28  ;;  %714 = vmatpush.msra.mxu3 %v713_v63  ;;  %v2924_v28 = vand.u32 4294901760, %v880_v11 }
  0x3b   :  { %658 = vmatpush.msra.mxu1 %v2702_v5  ;;  %682 = vmatpush.msra.mxu2 %v2775_v37  ;;  %v731_v5 = vand.u32 4294901760, %v730_v8  ;;  %v982_v20 = vand.u32 4294901760, %v2880_v14  ;;  %v988_v25 = vand.u32 4294901760, %v2892_v16  ;;  %v1025_v8 = vsub.f32 %v2980_v49, %v4103_v61 }
  0x3c   :  { %632 = vmatpush.msra.mxu0 %v531_v31  ;;  %720 = vmatpush.msra.mxu3 %v719_v6  ;;  %v2957_v39 = vsub.f32 %v880_v11, %v2924_v28 }
  0x3d   :  { %660 = vmatpush.msra.mxu1 %v2711_v18  ;;  %684 = vmatpush.msra.mxu2 %v2788_v42  ;;  %v737_v18 = vand.u32 4294901760, %v736_v13  ;;  %v983_v27 = vsub.f32 %v2880_v14, %v982_v20  ;;  %v989_v33 = vsub.f32 %v2892_v16, %v988_v25 }
  0x3e   :  { %636 = vmatpush.msra.mxu0 %v537_v38  ;;  %726 = vmatpush.msra.mxu3 %v725_v9  ;;  %v1000_v38 = vand.u32 4294901760, %v2922_v22  ;;  %v871_v9 = vld [vmem:[%s4084_s3 + $0x8] sm:$0xff] }
  0x3f   :  { %638 = vmatmul.f32.vlgmr.msra.gmra.mxu0 %v2553_v17  ;;  %662 = vmatpush.msra.mxu1 %v2729_v23  ;;  %v879_v23 = vld [vmem:[%s4084_s3 + $0x48] sm:$0xff]  ;;  %v990_v47 = vand.u32 4294901760, %v989_v33  ;;  %v3067_v29 = vand.u32 4294901760, %v871_v9 }
  0x40   :  { %686 = vmatpush.msra.mxu2 %v2807_v48  ;;  %664 = vmatmul.f32.vlgmr.msra.gmra.mxu1 %v2553_v17  ;;  %v2935_v31 = vand.u32 4294901760, %v879_v23 }
  0x41   :  { %788 = vmatpush.msrb.mxu1 %v2763_v34  ;;  %732 = vmatpush.msra.mxu3 %v731_v5 }
  0x42   :  { %688 = vmatpush.msra.mxu2 %v2816_v52  ;;  %757 = vmatpush.msrb.mxu0 %v2786_v41  ;;  %v2966_v43 = vsub.f32 %v879_v23, %v2935_v31  ;;  %v876_v41 = vld [vmem:[%s4084_s3 + $0x30] sm:$0xff] }
  0x43   :  { %790 = vmatpush.msrb.mxu1 %v2775_v37  ;;  %738 = vmatpush.msra.mxu3 %v737_v18 }
  0x44   :  { %818 = vmatpush.msrb.mxu2 %v711_v50  ;;  %740 = vmatmul.f32.vlgmr.msra.gmra.mxu3 %v2553_v17  ;;  %v875_v50 = vld [vmem:[%s4084_s3 + $0x28] sm:$0xff]  ;;  %v1018_v56 = vand.u32 4294901760, %v2966_v43 }
  0x45   :  { %694 = vmatmul.f32.vlgmr.msra.gmra.mxu2 %v2643_v57  ;;  %792 = vmatpush.msrb.mxu1 %v2788_v42  ;;  %v877_v57 = vld [vmem:[%s4084_s3 + $0x38] sm:$0xff]  ;;  %v3007_v60 = vand.u32 4294901760, %v875_v50 }
  0x46   :  { %822 = vmatpush.msrb.mxu2 %v717_v53  ;;  %852 = vmatpush.msrb.mxu3 %v2763_v34  ;;  %v984_v34 = vand.u32 4294901760, %v983_v27  ;;  %v2974_v46 = vand.u32 4294901760, %v877_v57  ;;  %v2991_v53 = vand.u32 4294901760, %v876_v41  ;;  %v1019_v1 = vsub.f32 %v2966_v43, %v1018_v56 }
  0x47   :  { %794 = vmatpush.msrb.mxu1 %v2807_v48  ;;  %760 = vmatpush.msrb.mxu0 %v2797_v45  ;;  %v1012_v45 = vand.u32 4294901760, %v2957_v39  ;;  %v3035_v7 = vsub.f32 %v875_v50, %v3007_v60  ;;  %v3089_v50 = vsub.f32 %v871_v9, %v3067_v29 }
  0x48   :  { %826 = vmatpush.msrb.mxu2 %v723_v58  ;;  %854 = vmatpush.msrb.mxu3 %v2775_v37  ;;  %v1001_v37 = vsub.f32 %v2922_v22, %v1000_v38  ;;  %v3005_v58 = vsub.f32 %v877_v57, %v2974_v46  ;;  %v3020_v63 = vsub.f32 %v876_v41, %v2991_v53 }
  0x49   :  { %796 = vmatpush.msrb.mxu1 %v2816_v52  ;;  %763 = vmatpush.msrb.mxu0 %v2812_v51  ;;  %v1007_v51 = vsub.f32 %v2940_v35, %v1006_v44  ;;  %v4098_v11 = vand.u32 4294901760, %v3035_v7 }
  0x4a   :  { %830 = vmatpush.msrb.mxu2 %v729_v62  ;;  %856 = vmatpush.msrb.mxu3 %v2788_v42  ;;  %v874_v42 = vld [vmem:[%s4084_s3 + $0x20] sm:$0xff]  ;;  %v1013_v62 = vsub.f32 %v2957_v39, %v1012_v45  ;;  %v4101_v6 = vand.u32 4294901760, %v3005_v58  ;;  %v4099_v15 = vand.u32 4294901760, %v3020_v63 }
  0x4b   :  { %985 = vmatpush.msra.mxu1 %v984_v34  ;;  %766 = vmatpush.msrb.mxu0 %v2823_v55  ;;  %v1002_v55 = vand.u32 4294901760, %v1001_v37  ;;  %v3022_v0 = vand.u32 4294901760, %v874_v42  ;;  %v3079_v34 = vand.u32 4294901760, %v870_v10  ;;  %v1043_v41 = vsub.f32 %v3035_v7, %v4098_v11 }
  0x4c   :  { %834 = vmatpush.msrb.mxu2 %v735_v2  ;;  %858 = vmatpush.msrb.mxu3 %v2807_v48  ;;  %v873_v48 = vld [vmem:[%s4084_s3 + $0x18] sm:$0xff]  ;;  %v1008_v2 = vand.u32 4294901760, %v1007_v51  ;;  %v1014_v13 = vand.u32 4294901760, %v1013_v62  ;;  %v1031_v18 = vsub.f32 %v3005_v58, %v4101_v6  ;;  %v1037_v27 = vsub.f32 %v3020_v63, %v4099_v15 }
  0x4d   :  { %991 = vmatpush.msra.mxu1 %v990_v47  ;;  %836 = vmatmul.f32.vlgmr.msrb.gmra.mxu2 %v2553_v17  ;;  %v3050_v5 = vsub.f32 %v874_v42, %v3022_v0  ;;  %v3099_v51 = vsub.f32 %v870_v10, %v3079_v34 }
  0x4e   :  { %1083 = vmatpush.msra.mxu2 %v2880_v14  ;;  %860 = vmatpush.msrb.mxu3 %v2816_v52  ;;  %v872_v52 = vld [vmem:[%s4084_s3 + $0x10] sm:$0xff]  ;;  %v1032_v40 = vand.u32 4294901760, %v1031_v18  ;;  %v1038_v37 = vand.u32 4294901760, %v1037_v27  ;;  %v898_v27 = vld [vmem:[%s4084_s3 + $0xe0] sm:$0xff]  ;;  %v891_v14 = vld [vmem:[%s4084_s3 + $0xa8] sm:$0xff] }
  0x4f   :  { %769 = vmatpush.msrb.mxu0 %v2833_v59  ;;  %997 = vmatpush.msra.mxu1 %v996_v54  ;;  %v3037_v59 = vand.u32 4294901760, %v873_v48  ;;  %v4096_v33 = vand.u32 4294901760, %v3050_v5 }
  0x50   :  { %1086 = vmatpush.msra.mxu2 %v2892_v16  ;;  %1136 = vmatpush.msra.mxu3 %v2857_v3  ;;  %v890_v16 = vld [vmem:[%s4084_s3 + $0xa0] sm:$0xff] }
  0x51   :  { %772 = vmatmul.f32.vlgmr.msrb.gmra.mxu0 %v2575_v26  ;;  %862 = vmatmul.f32.vlgmr.msrb.gmra.mxu3 %v2553_v17  ;;  %v3052_v26 = vand.u32 4294901760, %v872_v52  ;;  %v1020_v17 = vand.u32 4294901760, %v1019_v1  ;;  %v3065_v23 = vsub.f32 %v873_v48, %v3037_v59  ;;  %v1049_v54 = vsub.f32 %v3050_v5, %v4096_v33  ;;  %v901_v48 = vld [vmem:[%s4084_s3 + $0xf8] sm:$0xff] }
  0x52   :  { %1003 = vmatpush.msra.mxu1 %v1002_v55  ;;  %1089 = vmatpush.msra.mxu2 %v2905_v21  ;;  %v1044_v55 = vand.u32 4294901760, %v1043_v41  ;;  %v4091_v1 = vand.u32 4294901760, %v3089_v50  ;;  %v889_v21 = vld [vmem:[%s4084_s3 + $0x98] sm:$0xff] }
  0x53   :  { %1138 = vmatpush.msra.mxu3 %v2870_v12  ;;  %800 = vmatmul.f32.vlgmr.msrb.gmra.mxu1 %v2589_v32  ;;  %v1026_v32 = vand.u32 4294901760, %v1025_v8  ;;  %v3077_v57 = vsub.f32 %v872_v52, %v3052_v26  ;;  %v4094_v47 = vand.u32 4294901760, %v3065_v23  ;;  %v900_v52 = vld [vmem:[%s4084_s3 + $0xf0] sm:$0xff]  ;;  %v1050_v8 = vand.u32 4294901760, %v1049_v54 }
  0x54   :  { %940 = vmatpush.msra.mxu0 %v2857_v3  ;;  %1009 = vmatpush.msra.mxu1 %v1008_v2  ;;  %v3116_v2 = vand.u32 4294901760, %v901_v48  ;;  %v3128_v10 = vand.u32 4294901760, %v900_v52 }
  0x55   :  { %1092 = vmatpush.msra.mxu2 %v2922_v22  ;;  %1140 = vmatpush.msra.mxu3 %v2882_v4  ;;  %v4092_v42 = vand.u32 4294901760, %v3077_v57  ;;  %v1055_v62 = vsub.f32 %v3065_v23, %v4094_v47  ;;  %v888_v22 = vld [vmem:[%s4084_s3 + $0x90] sm:$0xff] }
  0x56   :  { %942 = vmatpush.msra.mxu0 %v2870_v12  ;;  %1015 = vmatpush.msra.mxu1 %v1014_v13  ;;  %v4090_v13 = vand.u32 4294901760, %v3099_v51 }
  0x57   :  { %1095 = vmatpush.msra.mxu2 %v2940_v35  ;;  %1142 = vmatpush.msra.mxu3 %v2899_v19  ;;  %v1061_v9 = vsub.f32 %v3077_v57, %v4092_v42  ;;  %v1056_v18 = vand.u32 4294901760, %v1055_v62  ;;  %v3156_v62 = vand.u32 4294901760, %v898_v27  ;;  %v887_v35 = vld [vmem:[%s4084_s3 + $0x88] sm:$0xff] }
  0x58   :  { %944 = vmatpush.msra.mxu0 %v2882_v4  ;;  %1021 = vmatpush.msra.mxu1 %v1020_v17  ;;  %v899_v17 = vld [vmem:[%s4084_s3 + $0xe8] sm:$0xff]  ;;  %v1073_v54 = vsub.f32 %v3099_v51, %v4090_v13 }
  0x59   :  { %1098 = vmatpush.msra.mxu2 %v2957_v39  ;;  %1144 = vmatpush.msra.mxu3 %v2912_v24  ;;  %v3142_v41 = vand.u32 4294901760, %v899_v17  ;;  %v886_v39 = vld [vmem:[%s4084_s3 + $0x80] sm:$0xff] }
  0x5a   :  { %946 = vmatpush.msra.mxu0 %v2899_v19  ;;  %1027 = vmatpush.msra.mxu1 %v1026_v32  ;;  %v1067_v32 = vsub.f32 %v3089_v50, %v4091_v1 }
  0x5b   :  { %1101 = vmatpush.msra.mxu2 %v2966_v43  ;;  %1146 = vmatpush.msra.mxu3 %v2924_v28  ;;  %v3163_v13 = vsub.f32 %v899_v17, %v3142_v41  ;;  %v896_v17 = vld [vmem:[%s4084_s3 + $0xd0] sm:$0xff]  ;;  %v4123_v43 = vand.u32 4294901760, %v2980_v49 }
  0x5c   :  { %948 = vmatpush.msra.mxu0 %v2912_v24  ;;  %1033 = vmatpush.msra.mxu1 %v1032_v40  ;;  %v3140_v40 = vsub.f32 %v901_v48, %v3116_v2  ;;  %v3154_v48 = vsub.f32 %v900_v52, %v3128_v10  ;;  %v1074_v52 = vand.u32 4294901760, %v1073_v54  ;;  %v3188_v42 = vand.u32 4294901760, %v896_v17 }
  0x5d   :  { %1104 = vmatpush.msra.mxu2 %v2980_v49  ;;  %1148 = vmatpush.msra.mxu3 %v2935_v31  ;;  %v4097_v54 = vand.u32 4294901760, %v3163_v13 }
  0x5e   :  { %950 = vmatpush.msra.mxu0 %v2924_v28  ;;  %1039 = vmatpush.msra.mxu1 %v1038_v37  ;;  %v1062_v37 = vand.u32 4294901760, %v1061_v9  ;;  %v4093_v9 = vand.u32 4294901760, %v3140_v40  ;;  %v3212_v33 = vsub.f32 %v896_v17, %v3188_v42 }
  0x5f   :  { %1107 = vmatpush.msra.mxu2 %v3005_v58  ;;  %1150 = vmatpush.msra.mxu3 %v2948_v36 }
  0x60   :  { %952 = vmatpush.msra.mxu0 %v2935_v31  ;;  %1045 = vmatpush.msra.mxu1 %v1044_v55  ;;  %v897_v55 = vld [vmem:[%s4084_s3 + $0xd8] sm:$0xff]  ;;  %v4104_v17 = vand.u32 4294901760, %v3212_v33 }
  0x61   :  { %1110 = vmatpush.msra.mxu2 %v3020_v63  ;;  %1152 = vmatpush.msra.mxu3 %v2974_v46  ;;  %v3165_v1 = vand.u32 4294901760, %v897_v55 }
  0x62   :  { %954 = vmatpush.msra.mxu0 %v2948_v36  ;;  %1051 = vmatpush.msra.mxu1 %v1050_v8  ;;  %v1068_v8 = vand.u32 4294901760, %v1067_v32  ;;  %v3172_v32 = vsub.f32 %v898_v27, %v3156_v62 }
  0x63   :  { %1113 = vmatpush.msra.mxu2 %v3035_v7  ;;  %1154 = vmatpush.msra.mxu3 %v2991_v53  ;;  %v3185_v27 = vsub.f32 %v897_v55, %v3165_v1 }
  0x64   :  { %956 = vmatpush.msra.mxu0 %v2974_v46  ;;  %1057 = vmatpush.msra.mxu1 %v1056_v18  ;;  %v4095_v18 = vand.u32 4294901760, %v3154_v48 }
  0x65   :  { %1116 = vmatpush.msra.mxu2 %v3050_v5  ;;  %1156 = vmatpush.msra.mxu3 %v3007_v60  ;;  %v4102_v47 = vand.u32 4294901760, %v3185_v27 }
  0x66   :  { %958 = vmatpush.msra.mxu0 %v2991_v53  ;;  %1063 = vmatpush.msra.mxu1 %v1062_v37  ;;  %v1324_v37 = vsub.f32 %v3140_v40, %v4093_v9  ;;  %v4100_v9 = vand.u32 4294901760, %v3172_v32 }
  0x67   :  { %1119 = vmatpush.msra.mxu2 %v3065_v23  ;;  %1158 = vmatpush.msra.mxu3 %v3022_v0 }
  0x68   :  { %960 = vmatpush.msra.mxu0 %v3007_v60  ;;  %1069 = vmatpush.msra.mxu1 %v1068_v8  ;;  %v1330_v8 = vsub.f32 %v3154_v48, %v4095_v18  ;;  %v1325_v55 = vand.u32 4294901760, %v1324_v37  ;;  %v895_v18 = vld [vmem:[%s4084_s3 + $0xc8] sm:$0xff] }
  0x69   :  { %1122 = vmatpush.msra.mxu2 %v3077_v57  ;;  %1160 = vmatpush.msra.mxu3 %v3037_v59 }
  0x6a   :  { %962 = vmatpush.msra.mxu0 %v3022_v0  ;;  %1075 = vmatpush.msra.mxu1 %v1074_v52  ;;  %v1336_v52 = vsub.f32 %v3163_v13, %v4097_v54  ;;  %v1331_v37 = vand.u32 4294901760, %v1330_v8  ;;  %v1342_v54 = vsub.f32 %v3172_v32, %v4100_v9  ;;  %v1348_v9 = vsub.f32 %v3185_v27, %v4102_v47 }
  0x6b   :  { %1125 = vmatpush.msra.mxu2 %v3089_v50  ;;  %1162 = vmatpush.msra.mxu3 %v3052_v26  ;;  %v1354_v47 = vsub.f32 %v3212_v33, %v4104_v17 }
  0x6c   :  { %1244 = vmatpush.msrb.mxu1 %v2857_v3  ;;  %964 = vmatpush.msra.mxu0 %v3037_v59  ;;  %v3209_v3 = vand.u32 4294901760, %v895_v18  ;;  %v1337_v8 = vand.u32 4294901760, %v1336_v52  ;;  %v1343_v52 = vand.u32 4294901760, %v1342_v54  ;;  %v1349_v54 = vand.u32 4294901760, %v1348_v9 }
  0x6d   :  { %1128 = vmatpush.msra.mxu2 %v3099_v51  ;;  %1164 = vmatpush.msra.mxu3 %v3067_v29  ;;  %v1355_v9 = vand.u32 4294901760, %v1354_v47 }
  0x6e   :  { %1246 = vmatpush.msrb.mxu1 %v2870_v12  ;;  %966 = vmatpush.msra.mxu0 %v3052_v26  ;;  %v894_v12 = vld [vmem:[%s4084_s3 + $0xc0] sm:$0xff]  ;;  %v3228_v15 = vsub.f32 %v895_v18, %v3209_v3 }
  0x6f   :  { %1281 = vmatpush.msrb.mxu2 %v3116_v2  ;;  %1166 = vmatpush.msra.mxu3 %v3079_v34  ;;  %v3225_v11 = vand.u32 4294901760, %v894_v12 }
  0x70   :  { %1248 = vmatpush.msrb.mxu1 %v2882_v4  ;;  %968 = vmatpush.msra.mxu0 %v3067_v29  ;;  %v893_v4 = vld [vmem:[%s4084_s3 + $0xb8] sm:$0xff]  ;;  %v1359_v6 = vand.u32 4294901760, %v3228_v15 }
  0x71   :  { %1283 = vmatpush.msrb.mxu2 %v3128_v10  ;;  %1326 = vmatpush.msrb.mxu3 %v1325_v55  ;;  %v3240_v18 = vand.u32 4294901760, %v893_v4  ;;  %v3243_v55 = vsub.f32 %v894_v12, %v3225_v11 }
  0x72   :  { %1250 = vmatpush.msrb.mxu1 %v2899_v19  ;;  %970 = vmatpush.msra.mxu0 %v3079_v34  ;;  %v892_v19 = vld [vmem:[%s4084_s3 + $0xb0] sm:$0xff] }
  0x73   :  { %1285 = vmatpush.msrb.mxu2 %v3142_v41  ;;  %1332 = vmatpush.msrb.mxu3 %v1331_v37  ;;  %v1365_v12 = vand.u32 4294901760, %v3243_v55  ;;  %v3256_v61 = vand.u32 4294901760, %v892_v19  ;;  %v1360_v37 = vsub.f32 %v3228_v15, %v1359_v6  ;;  %v3263_v17 = vsub.f32 %v893_v4, %v3240_v18 }
  0x74   :  { %1177 = vmatpush.msrb.mxu0 %v982_v20  ;;  %1252 = vmatpush.msrb.mxu1 %v2912_v24  ;;  %v3271_v20 = vand.u32 4294901760, %v891_v14 }
  0x75   :  { %1287 = vmatpush.msrb.mxu2 %v3156_v62  ;;  %1338 = vmatpush.msrb.mxu3 %v1337_v8  ;;  %v3274_v24 = vsub.f32 %v892_v19, %v3256_v61  ;;  %v1366_v8 = vsub.f32 %v3243_v55, %v1365_v12  ;;  %v1371_v4 = vand.u32 4294901760, %v3263_v17 }
  0x76   :  { %1181 = vmatpush.msrb.mxu0 %v988_v25  ;;  %1254 = vmatpush.msrb.mxu1 %v2924_v28  ;;  %v3288_v28 = vand.u32 4294901760, %v890_v16  ;;  %v3291_v47 = vsub.f32 %v891_v14, %v3271_v20 }
  0x77   :  { %1289 = vmatpush.msrb.mxu2 %v3165_v1  ;;  %1344 = vmatpush.msrb.mxu3 %v1343_v52  ;;  %v1377_v25 = vand.u32 4294901760, %v3274_v24  ;;  %v1361_v52 = vand.u32 4294901760, %v1360_v37  ;;  %v1372_v19 = vsub.f32 %v3263_v17, %v1371_v4  ;;  %v1367_v37 = vand.u32 4294901760, %v1366_v8 }
  0x78   :  { %1185 = vmatpush.msrb.mxu0 %v994_v30  ;;  %1256 = vmatpush.msrb.mxu1 %v2935_v31  ;;  %v1383_v30 = vand.u32 4294901760, %v3291_v47  ;;  %v3304_v31 = vand.u32 4294901760, %v889_v21 }
  0x79   :  { %1291 = vmatpush.msrb.mxu2 %v3188_v42  ;;  %1350 = vmatpush.msrb.mxu3 %v1349_v54  ;;  %v3307_v54 = vsub.f32 %v890_v16, %v3288_v28  ;;  %v1378_v14 = vsub.f32 %v3274_v24, %v1377_v25 }
  0x7a   :  { %1189 = vmatpush.msrb.mxu0 %v1000_v38  ;;  %1258 = vmatpush.msrb.mxu1 %v2948_v36  ;;  %v3320_v38 = vand.u32 4294901760, %v888_v22  ;;  %v1384_v8 = vsub.f32 %v3291_v47, %v1383_v30  ;;  %v3327_v16 = vsub.f32 %v889_v21, %v3304_v31 }
  0x7b   :  { %1293 = vmatpush.msrb.mxu2 %v3209_v3  ;;  %1356 = vmatpush.msrb.mxu3 %v1355_v9  ;;  %v1389_v36 = vand.u32 4294901760, %v3307_v54  ;;  %v1373_v9 = vand.u32 4294901760, %v1372_v19 }
  0x7c   :  { %1193 = vmatpush.msrb.mxu0 %v1006_v44  ;;  %1260 = vmatpush.msrb.mxu1 %v2974_v46  ;;  %v3335_v44 = vand.u32 4294901760, %v887_v35  ;;  %v3338_v46 = vsub.f32 %v888_v22, %v3320_v38  ;;  %v1395_v21 = vand.u32 4294901760, %v3327_v16 }
  0x7d   :  { %1295 = vmatpush.msrb.mxu2 %v3225_v11  ;;  %1362 = vmatpush.msrb.mxu3 %v1361_v52  ;;  %v1379_v52 = vand.u32 4294901760, %v1378_v14  ;;  %v1390_v19 = vsub.f32 %v3307_v54, %v1389_v36  ;;  %v1385_v14 = vand.u32 4294901760, %v1384_v8  ;;  %v4124_v8 = vand.u32 4294901760, %v3005_v58 }
  0x7e   :  { %1197 = vmatpush.msrb.mxu0 %v1012_v45  ;;  %1262 = vmatpush.msrb.mxu1 %v2991_v53  ;;  %v1401_v45 = vand.u32 4294901760, %v3338_v46  ;;  %v3352_v53 = vand.u32 4294901760, %v886_v39  ;;  %v1396_v22 = vsub.f32 %v3327_v16, %v1395_v21 }
  0x7f   :  { %1297 = vmatpush.msrb.mxu2 %v3240_v18  ;;  %1368 = vmatpush.msrb.mxu3 %v1367_v37  ;;  %v3355_v37 = vsub.f32 %v887_v35, %v3335_v44  ;;  %v1391_v35 = vand.u32 4294901760, %v1390_v19  ;;  %v4125_v19 = vand.u32 4294901760, %v3020_v63 }
  0x80   :  { %1201 = vmatpush.msrb.mxu0 %v1018_v56  ;;  %1264 = vmatpush.msrb.mxu1 %v3007_v60  ;;  %v3366_v60 = vsub.f32 %v886_v39, %v3352_v53  ;;  %v4126_v39 = vand.u32 4294901760, %v3035_v7 }
  0x81   :  { %1299 = vmatpush.msrb.mxu2 %v3256_v61  ;;  %1374 = vmatpush.msrb.mxu3 %v1373_v9  ;;  %v1407_v56 = vand.u32 4294901760, %v3355_v37  ;;  %v1402_v9 = vsub.f32 %v3338_v46, %v1401_v45 }
  0x82   :  { %1205 = vmatpush.msrb.mxu0 %v4123_v43  ;;  %1266 = vmatpush.msrb.mxu1 %v3022_v0  ;;  %v1413_v49 = vand.u32 4294901760, %v3366_v60  ;;  %v1397_v0 = vand.u32 4294901760, %v1396_v22  ;;  %v4129_v43 = vand.u32 4294901760, %v3077_v57 }
  0x83   :  { %1301 = vmatpush.msrb.mxu2 %v3271_v20  ;;  %1380 = vmatpush.msrb.mxu3 %v1379_v52  ;;  %v1408_v52 = vsub.f32 %v3355_v37, %v1407_v56  ;;  %v1403_v58 = vand.u32 4294901760, %v1402_v9  ;;  %v4131_v9 = vand.u32 4294901760, %v3099_v51 }
  0x84   :  { %1209 = vmatpush.msrb.mxu0 %v4124_v8  ;;  %1268 = vmatpush.msrb.mxu1 %v3037_v59  ;;  %v1414_v59 = vsub.f32 %v3366_v60, %v1413_v49 }
  0x85   :  { %1303 = vmatpush.msrb.mxu2 %v3288_v28  ;;  %1386 = vmatpush.msrb.mxu3 %v1385_v14  ;;  %v1409_v63 = vand.u32 4294901760, %v1408_v52  ;;  %v4127_v14 = vand.u32 4294901760, %v3050_v5 }
  0x86   :  { %1213 = vmatpush.msrb.mxu0 %v4125_v19  ;;  %1270 = vmatpush.msrb.mxu1 %v3052_v26  ;;  %v3394_v26 = vld [vmem:[%s4085_s2] sm:$0xf]  ;;  %v1415_v7 = vand.u32 4294901760, %v1414_v59 }
  0x87   :  { %1305 = vmatpush.msrb.mxu2 %v3304_v31  ;;  %1392 = vmatpush.msrb.mxu3 %v1391_v35  ;;  %v49_v22 = vperm.slane %v3394_v26, 0  ;;  %v4130_v35 = vand.u32 4294901760, %v3089_v50  ;;  %v50_v57 = vperm.slane %v3394_v26, 1 }
  0x88   :  { %1217 = vmatpush.msrb.mxu0 %v4126_v39  ;;  %1272 = vmatpush.msrb.mxu1 %v3067_v29  ;;  %v4128_v29 = vand.u32 4294901760, %v3065_v23 }
  0x89   :  { %1307 = vmatpush.msrb.mxu2 %v3320_v38  ;;  %1398 = vmatpush.msrb.mxu3 %v1397_v0 }
  0x8a   :  { %1221 = vmatpush.msrb.mxu0 %v4127_v14  ;;  %1274 = vmatpush.msrb.mxu1 %v3079_v34 }
  0x8b   :  { %1309 = vmatpush.msrb.mxu2 %v3335_v44  ;;  %1404 = vmatpush.msrb.mxu3 %v1403_v58 }
  0x8c   :  { %1225 = vmatpush.msrb.mxu0 %v4128_v29 }
  0x8d   :  { %1311 = vmatpush.msrb.mxu2 %v3352_v53  ;;  %1410 = vmatpush.msrb.mxu3 %v1409_v63 }
  0x8e   :  { %1229 = vmatpush.msrb.mxu0 %v4129_v43 }
  0x8f   :  { %1416 = vmatpush.msrb.mxu3 %v1415_v7  ;;  %v101_v5 = vpop.f32.mrf.mxu0 }
  0x90   :  { %1233 = vmatpush.msrb.mxu0 %v4130_v35  ;;  %v102_v34 = vadd.f32 %v101_v5, %v49_v22 }
  0x92   :  { %1237 = vmatpush.msrb.mxu0 %v4131_v9 }
  0x93   :  { %v147_v8 = vpop.f32.mrf.mxu1  ;;  %v179_v23 = vpop.f32.mrf.mxu2 }
  0x94   :  { %v148_v0 = vadd.f32 %v147_v8, %v102_v34 }
  0x96   :  { %v180_v52 = vadd.f32 %v179_v23, %v148_v0  ;;  %v4132_v23 = vand.u32 4294901760, %v3140_v40 }
  0x97   :  { %v207_v19 = vpop.f32.mrf.mxu3 }
  0x98   :  { %v208_v58 = vadd.f32 %v207_v19, %v180_v52 }
  0x9b   :  { %v243_v59 = vpop.f32.mrf.mxu0 }
  0x9c   :  { %v244_v39 = vadd.f32 %v243_v59, %v208_v58  ;;  %v4133_v58 = vand.u32 4294901760, %v3154_v48 }
  0x9e   :  { %v269_v63 = vpop.f32.mrf.mxu1 }
  0x9f   :  { %v270_v14 = vadd.f32 %v269_v63, %v244_v39 }
  0xa0   :  { %v299_v7 = vpop.f32.mrf.mxu2 }
  0xa1   :  { %v866_v29 = vmax.f32 %v270_v14, 0.0  ;;  %v300_v50 = vadd.f32 %v299_v7, %v50_v57  ;;  %v4134_v57 = vand.u32 4294901760, %v3163_v13  ;;  %v4135_v7 = vand.u32 4294901760, %v3172_v32 }
  0xa3   :  { %v971_v43 = vand.u32 4294901760, %v866_v29  ;;  %v345_v22 = vpop.f32.mrf.mxu3 }
  0xa4   :  { %v346_v5 = vadd.f32 %v345_v22, %v300_v50 }
  0xa5   :  { %v972_v51 = vsub.f32 %v866_v29, %v971_v43  ;;  %1077 = vmatmul.f32.vlgmr.msra.gmra.mxu1 %v971_v43  ;;  %v4136_v29 = vand.u32 4294901760, %v3185_v27 }
  0xa6   :  { %v377_v35 = vpop.f32.mrf.mxu0  ;;  %1477 = vmatpush.msra.mxu1 %v3116_v2 }
  0xa7   :  { %v973_v34 = vand.u32 4294901760, %v972_v51  ;;  %v378_v9 = vadd.f32 %v377_v35, %v346_v5  ;;  %1131 = vmatmul.f32.vlgmr.msra.gmra.mxu2 %v972_v51  ;;  %v51_v5 = vperm.slane %v3394_v26, 2 }
  0xa8   :  { %v405_v8 = vpop.f32.mrf.mxu1  ;;  %1479 = vmatpush.msra.mxu1 %v3128_v10  ;;  %1518 = vmatpush.msra.mxu2 %v4132_v23 }
  0xa9   :  { %v974_v0 = vsub.f32 %v972_v51, %v973_v34  ;;  %v406_v52 = vadd.f32 %v405_v8, %v378_v9  ;;  %1170 = vmatmul.f32.vlgmr.msra.gmra.mxu3 %v973_v34 }
  0xaa   :  { %v441_v19 = vpop.f32.mrf.mxu2  ;;  %1481 = vmatpush.msra.mxu1 %v3142_v41  ;;  %1522 = vmatpush.msra.mxu2 %v4133_v58 }
  0xab   :  { %v442_v59 = vadd.f32 %v441_v19, %v406_v52  ;;  %1585 = vmatpush.msra.mxu3 %v3116_v2  ;;  %v975_v39 = vand.u32 4294901760, %v974_v0 }
  0xac   :  { %1483 = vmatpush.msra.mxu1 %v3156_v62  ;;  %1526 = vmatpush.msra.mxu2 %v4134_v57 }
  0xad   :  { %v467_v63 = vpop.f32.mrf.mxu3  ;;  %1587 = vmatpush.msra.mxu3 %v3128_v10  ;;  %976 = vmatmul.f32.vlgmr.msra.gmra.mxu0 %v975_v39  ;;  %v917_v10 = vld [vmem:[%s4084_s3 + $0x178] sm:$0xff] }
  0xae   :  { %v468_v14 = vadd.f32 %v467_v63, %v442_v59  ;;  %1276 = vmatmul.f32.vlgmr.msrb.gmra.mxu1 %v971_v43  ;;  %1424 = vmatpush.msra.mxu0 %v3140_v40  ;;  %v3450_v22 = vand.u32 4294901760, %v917_v10 }
  0xaf   :  { %1485 = vmatpush.msra.mxu1 %v3165_v1  ;;  %1530 = vmatpush.msra.mxu2 %v4135_v7 }
  0xb0   :  { %v867_v2 = vmax.f32 %v468_v14, 0.0  ;;  %1589 = vmatpush.msra.mxu3 %v3142_v41  ;;  %1427 = vmatpush.msra.mxu0 %v3154_v48  ;;  %v4137_v41 = vand.u32 4294901760, %v3212_v33  ;;  %v916_v48 = vld [vmem:[%s4084_s3 + $0x170] sm:$0xff] }
  0xb1   :  { %1487 = vmatpush.msra.mxu1 %v3188_v42  ;;  %1534 = vmatpush.msra.mxu2 %v4136_v29 }
  0xb2   :  { %v3435_v40 = vand.u32 4294901760, %v867_v2  ;;  %1591 = vmatpush.msra.mxu3 %v3156_v62  ;;  %1430 = vmatpush.msra.mxu0 %v3163_v13  ;;  %v3457_v62 = vand.u32 4294901760, %v916_v48 }
  0xb3   :  { %1489 = vmatpush.msra.mxu1 %v3209_v3  ;;  %1538 = vmatpush.msra.mxu2 %v4137_v41 }
  0xb4   :  { %v3446_v50 = vsub.f32 %v867_v2, %v3435_v40  ;;  %1593 = vmatpush.msra.mxu3 %v3165_v1  ;;  %1433 = vmatpush.msra.mxu0 %v3172_v32  ;;  %v915_v1 = vld [vmem:[%s4084_s3 + $0x168] sm:$0xff]  ;;  %v497_v51 = vpop.f32.mrf.mxu0 }
  0xb5   :  { %1491 = vmatpush.msra.mxu1 %v3225_v11  ;;  %1542 = vmatpush.msra.mxu2 %v1359_v6  ;;  %v3471_v6 = vsub.f32 %v917_v10, %v3450_v22  ;;  %v498_v0 = vadd.f32 %v497_v51, %v51_v5 }
  0xb6   :  { %v1314_v13 = vand.u32 4294901760, %v3446_v50  ;;  %1595 = vmatpush.msra.mxu3 %v3188_v42  ;;  %1239 = vmatmul.f32.vlgmr.msrb.gmra.mxu0 %v971_v43  ;;  %v3475_v42 = vand.u32 4294901760, %v915_v1  ;;  %v912_v43 = vld [vmem:[%s4084_s3 + $0x150] sm:$0xff] }
  0xb7   :  { %1436 = vmatpush.msra.mxu0 %v3185_v27  ;;  %1493 = vmatpush.msra.mxu1 %v3240_v18  ;;  %v914_v27 = vld [vmem:[%s4084_s3 + $0x160] sm:$0xff]  ;;  %v3524_v34 = vand.u32 4294901760, %v912_v43 }
  0xb8   :  { %v1315_v32 = vsub.f32 %v3446_v50, %v1314_v13  ;;  %1546 = vmatpush.msra.mxu2 %v1365_v12  ;;  %1597 = vmatpush.msra.mxu3 %v3209_v3  ;;  %v3484_v3 = vsub.f32 %v916_v48, %v3457_v62 }
  0xb9   :  { %1439 = vmatpush.msra.mxu0 %v3212_v33  ;;  %1495 = vmatpush.msra.mxu1 %v3256_v61  ;;  %v913_v33 = vld [vmem:[%s4084_s3 + $0x158] sm:$0xff]  ;;  %v3555_v58 = vsub.f32 %v912_v43, %v3524_v34 }
  0xba   :  { %1550 = vmatpush.msra.mxu2 %v1371_v4  ;;  %1599 = vmatpush.msra.mxu3 %v3225_v11  ;;  %v1316_v12 = vand.u32 4294901760, %v1315_v32  ;;  %v1664_v4 = vand.u32 4294901760, %v3471_v6  ;;  %v3495_v11 = vand.u32 4294901760, %v914_v27  ;;  %v905_v32 = vld [vmem:[%s4084_s3 + $0x118] sm:$0xff] }
  0xbb   :  { %1442 = vmatpush.msra.mxu0 %v3228_v15  ;;  %1497 = vmatpush.msra.mxu1 %v3271_v20  ;;  %v3499_v15 = vsub.f32 %v915_v1, %v3475_v42  ;;  %v4117_v2 = vand.u32 4294901760, %v3555_v58  ;;  %v603_v1 = vpop.f32.mrf.mxu3  ;;  %v3635_v51 = vand.u32 4294901760, %v905_v32 }
  0xbc   :  { %1554 = vmatpush.msra.mxu2 %v1377_v25  ;;  %1601 = vmatpush.msra.mxu3 %v3240_v18  ;;  %v4122_v18 = vand.u32 4294901760, %v3484_v3  ;;  %v3508_v25 = vand.u32 4294901760, %v913_v33  ;;  %v3522_v35 = vsub.f32 %v914_v27, %v3495_v11 }
  0xbd   :  { %1317 = vmatmul.f32.vlgmr.msrb.gmra.mxu2 %v1316_v12  ;;  %1445 = vmatpush.msra.mxu0 %v3243_v55  ;;  %v911_v55 = vld [vmem:[%s4084_s3 + $0x148] sm:$0xff] }
  0xbe   :  { %1499 = vmatpush.msra.mxu1 %v3288_v28  ;;  %1558 = vmatpush.msra.mxu2 %v1383_v30  ;;  %v1665_v30 = vsub.f32 %v3471_v6, %v1664_v4  ;;  %v3533_v9 = vand.u32 4294901760, %v911_v55  ;;  %v1671_v8 = vsub.f32 %v3484_v3, %v4122_v18  ;;  %v3541_v23 = vsub.f32 %v913_v33, %v3508_v25 }
  0xbf   :  { %1603 = vmatpush.msra.mxu3 %v3256_v61  ;;  %1448 = vmatpush.msra.mxu0 %v3263_v17  ;;  %v910_v61 = vld [vmem:[%s4084_s3 + $0x140] sm:$0xff]  ;;  %v4120_v17 = vand.u32 4294901760, %v3499_v15  ;;  %v4119_v19 = vand.u32 4294901760, %v3522_v35 }
  0xc0   :  { %1418 = vmatmul.f32.vlgmr.msrb.gmra.mxu3 %v3435_v40  ;;  %1501 = vmatpush.msra.mxu1 %v3304_v31  ;;  %v1666_v52 = vand.u32 4294901760, %v1665_v30  ;;  %v1672_v59 = vand.u32 4294901760, %v1671_v8  ;;  %v4118_v39 = vand.u32 4294901760, %v3541_v23  ;;  %v639_v8 = vpop.f32.mrf.mxu0 }
  0xc1   :  { %1562 = vmatpush.msra.mxu2 %v1389_v36  ;;  %1605 = vmatpush.msra.mxu3 %v3271_v20  ;;  %v3546_v20 = vand.u32 4294901760, %v910_v61  ;;  %v543_v36 = vpop.f32.mrf.mxu1  ;;  %v1683_v7 = vsub.f32 %v3522_v35, %v4119_v19 }
  0xc2   :  { %1451 = vmatpush.msra.mxu0 %v3274_v24  ;;  %1503 = vmatpush.msra.mxu1 %v3320_v38  ;;  %v909_v24 = vld [vmem:[%s4084_s3 + $0x138] sm:$0xff]  ;;  %v544_v57 = vadd.f32 %v543_v36, %v498_v0  ;;  %v1689_v10 = vsub.f32 %v3541_v23, %v4118_v39 }
  0xc3   :  { %1566 = vmatpush.msra.mxu2 %v1395_v21  ;;  %1607 = vmatpush.msra.mxu3 %v3288_v28  ;;  %v908_v28 = vld [vmem:[%s4084_s3 + $0x130] sm:$0xff]  ;;  %v3567_v21 = vsub.f32 %v911_v55, %v3533_v9  ;;  %v3572_v63 = vand.u32 4294901760, %v909_v24  ;;  %v1684_v27 = vand.u32 4294901760, %v1683_v7  ;;  %v52_v7 = vperm.slane %v3394_v26, 3 }
  0xc4   :  { %1454 = vmatpush.msra.mxu0 %v3291_v47  ;;  %1505 = vmatpush.msra.mxu1 %v3335_v44  ;;  %v1677_v47 = vsub.f32 %v3499_v15, %v4120_v17  ;;  %v3583_v14 = vand.u32 4294901760, %v908_v28  ;;  %v1690_v43 = vand.u32 4294901760, %v1689_v10 }
  0xc5   :  { %1570 = vmatpush.msra.mxu2 %v1401_v45  ;;  %1609 = vmatpush.msra.mxu3 %v3304_v31  ;;  %v907_v31 = vld [vmem:[%s4084_s3 + $0x128] sm:$0xff]  ;;  %v3581_v45 = vsub.f32 %v910_v61, %v3546_v20 }
  0xc6   :  { %1457 = vmatpush.msra.mxu0 %v3307_v54  ;;  %1507 = vmatpush.msra.mxu1 %v3352_v53  ;;  %v575_v54 = vpop.f32.mrf.mxu2  ;;  %v3594_v29 = vand.u32 4294901760, %v907_v31  ;;  %v3610_v48 = vsub.f32 %v908_v28, %v3583_v14  ;;  %v902_v28 = vld [vmem:[%s4084_s3 + $0x100] sm:$0xff] }
  0xc7   :  { %1574 = vmatpush.msra.mxu2 %v1407_v56  ;;  %1611 = vmatpush.msra.mxu3 %v3320_v38  ;;  %v1678_v38 = vand.u32 4294901760, %v1677_v47  ;;  %v4115_v56 = vand.u32 4294901760, %v3567_v21  ;;  %v4113_v41 = vand.u32 4294901760, %v3581_v45  ;;  %v3679_v10 = vand.u32 4294901760, %v902_v28 }
  0xc8   :  { %1667 = vmatpush.msrb.mxu1 %v1666_v52  ;;  %1460 = vmatpush.msra.mxu0 %v3327_v16  ;;  %v906_v16 = vld [vmem:[%s4084_s3 + $0x120] sm:$0xff]  ;;  %v3627_v33 = vsub.f32 %v907_v31, %v3594_v29  ;;  %v4111_v61 = vand.u32 4294901760, %v3610_v48 }
  0xc9   :  { %1578 = vmatpush.msra.mxu2 %v1413_v49  ;;  %1613 = vmatpush.msra.mxu3 %v3335_v44  ;;  %v3604_v49 = vsub.f32 %v909_v24, %v3572_v63  ;;  %v576_v44 = vadd.f32 %v575_v54, %v544_v57  ;;  %v1701_v12 = vsub.f32 %v3567_v21, %v4115_v56  ;;  %v665_v54 = vpop.f32.mrf.mxu1  ;;  %v919_v56 = vld [vmem:[%s4084_s3 + $0x188] sm:$0xff] }
  0xca   :  { %1673 = vmatpush.msrb.mxu1 %v1672_v59  ;;  %1463 = vmatpush.msra.mxu0 %v3338_v46  ;;  %v1695_v46 = vsub.f32 %v3555_v58, %v4117_v2  ;;  %v1707_v30 = vsub.f32 %v3581_v45, %v4113_v41  ;;  %v4110_v52 = vand.u32 4294901760, %v3627_v33  ;;  %v3664_v57 = vsub.f32 %v905_v32, %v3635_v51  ;;  %v918_v2 = vld [vmem:[%s4084_s3 + $0x180] sm:$0xff] }
  0xcb   :  { %1765 = vmatpush.msrb.mxu2 %v3471_v6  ;;  %1615 = vmatpush.msra.mxu3 %v3352_v53  ;;  %v3620_v53 = vand.u32 4294901760, %v906_v16  ;;  %v4112_v55 = vand.u32 4294901760, %v3604_v49  ;;  %v604_v5 = vadd.f32 %v603_v1, %v576_v44  ;;  %v1702_v24 = vand.u32 4294901760, %v1701_v12  ;;  %v926_v1 = vld [vmem:[%s4084_s3 + $0x1c0] sm:$0xf] }
  0xcc   :  { %1580 = vmatmul.f32.vlgmr.msra.gmra.mxu2 %v3435_v40  ;;  %1617 = vmatmul.f32.vlgmr.msra.gmra.mxu3 %v3435_v40  ;;  %v904_v40 = vld [vmem:[%s4084_s3 + $0x110] sm:$0xff]  ;;  %v1696_v0 = vand.u32 4294901760, %v1695_v46  ;;  %v1708_v31 = vand.u32 4294901760, %v1707_v30  ;;  %v1725_v26 = vsub.f32 %v3627_v33, %v4110_v52  ;;  %v4107_v46 = vand.u32 4294901760, %v3664_v57  ;;  %v921_v52 = vld [vmem:[%s4084_s3 + $0x198] sm:$0xff] }
  0xcd   :  { %1679 = vmatpush.msrb.mxu1 %v1678_v38  ;;  %1768 = vmatpush.msrb.mxu2 %v3484_v3  ;;  %v3649_v36 = vsub.f32 %v906_v16, %v3620_v53  ;;  %v1713_v47 = vsub.f32 %v3604_v49, %v4112_v55  ;;  %v640_v59 = vadd.f32 %v639_v8, %v604_v5  ;;  %v3792_v41 = vand.u32 4294901760, %v921_v52 }
  0xce   :  { %1818 = vmatpush.msrb.mxu3 %v3450_v22  ;;  %1466 = vmatpush.msra.mxu0 %v3355_v37  ;;  %v903_v37 = vld [vmem:[%s4084_s3 + $0x108] sm:$0xff]  ;;  %v695_v44 = vpop.f32.mrf.mxu2  ;;  %v3821_v17 = vand.u32 4294901760, %v919_v56 }
  0xcf   :  { %1511 = vmatmul.f32.vlgmr.msra.gmra.mxu1 %v1314_v13  ;;  %1771 = vmatpush.msrb.mxu2 %v3499_v15  ;;  %v3651_v13 = vand.u32 4294901760, %v904_v40  ;;  %v4109_v38 = vand.u32 4294901760, %v3649_v36  ;;  %v1714_v32 = vand.u32 4294901760, %v1713_v47  ;;  %v925_v47 = vld [vmem:[%s4084_s3 + $0x1b8] sm:$0xff]  ;;  %v3819_v19 = vsub.f32 %v921_v52, %v3792_v41 }
  0xd0   :  { %1685 = vmatpush.msrb.mxu1 %v1684_v27  ;;  %1820 = vmatpush.msrb.mxu3 %v3457_v62  ;;  %v666_v27 = vadd.f32 %v665_v54, %v640_v59 }
  0xd1   :  { %1469 = vmatpush.msra.mxu0 %v3366_v60  ;;  %1774 = vmatpush.msrb.mxu2 %v3522_v35  ;;  %v3666_v60 = vand.u32 4294901760, %v903_v37  ;;  %v3677_v16 = vsub.f32 %v904_v40, %v3651_v13  ;;  %v696_v40 = vadd.f32 %v695_v44, %v52_v7  ;;  %v1731_v30 = vsub.f32 %v3649_v36, %v4109_v38 }
  0xd2   :  { %1472 = vmatmul.f32.vlgmr.msra.gmra.mxu0 %v3446_v50  ;;  %1691 = vmatpush.msrb.mxu1 %v1690_v43  ;;  %v1719_v50 = vsub.f32 %v3610_v48, %v4111_v61  ;;  %v937_v43 = vsel %vm935_vm2, %v926_v1, 0  ;;  %v868_v59 = vmax.f32 %v666_v27, 0.0  ;;  %v2035_v18 = vand.u32 4294901760, %v3819_v19 }
  0xd3   :  { %1622 = vmatpush.msrb.mxu0 %v3450_v22  ;;  %1822 = vmatpush.msrb.mxu3 %v3475_v42  ;;  %v3692_v12 = vsub.f32 %v903_v37, %v3666_v60  ;;  %v4106_v8 = vand.u32 4294901760, %v3677_v16  ;;  %v741_v37 = vpop.f32.mrf.mxu3  ;;  %v1732_v7 = vand.u32 4294901760, %v1731_v30 }
  0xd4   :  { %1697 = vmatpush.msrb.mxu1 %v1696_v0  ;;  %1777 = vmatpush.msrb.mxu2 %v3541_v23  ;;  %v1720_v5 = vand.u32 4294901760, %v1719_v50  ;;  %v3702_v0 = vsub.f32 %v902_v28, %v3679_v10  ;;  %v3714_v50 = vand.u32 4294901760, %v937_v43  ;;  %v742_v54 = vadd.f32 %v741_v37, %v696_v40  ;;  %v924_v37 = vld [vmem:[%s4084_s3 + $0x1b0] sm:$0xff] }
  0xd5   :  { %1624 = vmatpush.msrb.mxu0 %v3457_v62  ;;  %1824 = vmatpush.msrb.mxu3 %v3495_v11  ;;  %v4105_v28 = vand.u32 4294901760, %v3692_v12  ;;  %v1743_v44 = vsub.f32 %v3677_v16, %v4106_v8  ;;  %v3728_v27 = vand.u32 4294901760, %v868_v59  ;;  %v801_v8 = vpop.f32.mrf.mxu1 }
  0xd6   :  { %1703 = vmatpush.msrb.mxu1 %v1702_v24  ;;  %1780 = vmatpush.msrb.mxu2 %v3555_v58  ;;  %v1726_v24 = vand.u32 4294901760, %v1725_v26  ;;  %v4108_v1 = vand.u32 4294901760, %v3702_v0  ;;  %v3723_v26 = vand.u32 4294901760, %v925_v47  ;;  %v3734_v30 = vsub.f32 %v937_v43, %v3714_v50 }
  0xd7   :  { %1626 = vmatpush.msrb.mxu0 %v3475_v42  ;;  %1826 = vmatpush.msrb.mxu3 %v3508_v25 }
  0xd8   :  { %1709 = vmatpush.msrb.mxu1 %v1708_v31  ;;  %1783 = vmatpush.msrb.mxu2 %v3567_v21  ;;  %v1737_v31 = vsub.f32 %v3664_v57, %v4107_v46  ;;  %v3746_v43 = vsub.f32 %v925_v47, %v3723_v26  ;;  %v923_v46 = vld [vmem:[%s4084_s3 + $0x1a8] sm:$0xff]  ;;  %v4114_v47 = vand.u32 4294901760, %v3734_v30 }
  0xd9   :  { %1628 = vmatpush.msrb.mxu0 %v3495_v11  ;;  %1828 = vmatpush.msrb.mxu3 %v3524_v34  ;;  %v3765_v38 = vand.u32 4294901760, %v923_v46 }
  0xda   :  { %1715 = vmatpush.msrb.mxu1 %v1714_v32  ;;  %1786 = vmatpush.msrb.mxu2 %v3581_v45  ;;  %v773_v32 = vpop.f32.mrf.mxu0  ;;  %v1738_v40 = vand.u32 4294901760, %v1737_v31  ;;  %v1744_v31 = vand.u32 4294901760, %v1743_v44 }
  0xdb   :  { %1630 = vmatpush.msrb.mxu0 %v3508_v25  ;;  %1830 = vmatpush.msrb.mxu3 %v3533_v9  ;;  %v3790_v55 = vsub.f32 %v923_v46, %v3765_v38 }
  0xdc   :  { %1721 = vmatpush.msrb.mxu1 %v1720_v5  ;;  %1789 = vmatpush.msrb.mxu2 %v3604_v49  ;;  %v1749_v5 = vsub.f32 %v3692_v12, %v4105_v28  ;;  %v1755_v28 = vsub.f32 %v3702_v0, %v4108_v1 }
  0xdd   :  { %1632 = vmatpush.msrb.mxu0 %v3524_v34  ;;  %1832 = vmatpush.msrb.mxu3 %v3546_v20 }
  0xde   :  { %1727 = vmatpush.msrb.mxu1 %v1726_v24  ;;  %1792 = vmatpush.msrb.mxu2 %v3610_v48  ;;  %v774_v24 = vadd.f32 %v773_v32, %v742_v54  ;;  %v3753_v54 = vand.u32 4294901760, %v924_v37  ;;  %v1750_v44 = vand.u32 4294901760, %v1749_v5  ;;  %v922_v32 = vld [vmem:[%s4084_s3 + $0x1a0] sm:$0xff]  ;;  %v837_v5 = vpop.f32.mrf.mxu2 }
  0xdf   :  { %1634 = vmatpush.msrb.mxu0 %v3533_v9  ;;  %1834 = vmatpush.msrb.mxu3 %v3572_v63 }
  0xe0   :  { %1733 = vmatpush.msrb.mxu1 %v1732_v7  ;;  %1795 = vmatpush.msrb.mxu2 %v3627_v33  ;;  %v3756_v7 = vsub.f32 %v868_v59, %v3728_v27  ;;  %v802_v1 = vadd.f32 %v801_v8, %v774_v24  ;;  %v1756_v59 = vand.u32 4294901760, %v1755_v28  ;;  %v3775_v61 = vsub.f32 %v924_v37, %v3753_v54 }
  0xe1   :  { %1636 = vmatpush.msrb.mxu0 %v3546_v20  ;;  %1836 = vmatpush.msrb.mxu3 %v3583_v14  ;;  %v3777_v8 = vand.u32 4294901760, %v922_v32  ;;  %v2006_v28 = vsub.f32 %v3734_v30, %v4114_v47  ;;  %v863_v47 = vpop.f32.mrf.mxu3 }
  0xe2   :  { %1739 = vmatpush.msrb.mxu1 %v1738_v40  ;;  %1798 = vmatpush.msrb.mxu2 %v3649_v36  ;;  %v4116_v40 = vand.u32 4294901760, %v3746_v43  ;;  %v1655_v24 = vand.u32 4294901760, %v3756_v7  ;;  %v838_v37 = vadd.f32 %v837_v5, %v802_v1  ;;  %v4121_v46 = vand.u32 4294901760, %v3775_v61 }
  0xe3   :  { %1638 = vmatpush.msrb.mxu0 %v3572_v63  ;;  %1838 = vmatpush.msrb.mxu3 %v3594_v29  ;;  %v3805_v1 = vsub.f32 %v922_v32, %v3777_v8  ;;  %v2023_v32 = vand.u32 4294901760, %v3790_v55 }
  0xe4   :  { %1745 = vmatpush.msrb.mxu1 %v1744_v31  ;;  %1801 = vmatpush.msrb.mxu2 %v3664_v57  ;;  %v920_v31 = vld [vmem:[%s4084_s3 + $0x190] sm:$0xff]  ;;  %v1656_v5 = vsub.f32 %v3756_v7, %v1655_v24  ;;  %v864_v39 = vadd.f32 %v863_v47, %v838_v37  ;;  %v3834_v37 = vand.u32 4294901760, %v918_v2 }
  0xe5   :  { %1640 = vmatpush.msrb.mxu0 %v3583_v14  ;;  %1840 = vmatpush.msrb.mxu3 %v3620_v53  ;;  %v2029_v47 = vand.u32 4294901760, %v3805_v1 }
  0xe6   :  { %1751 = vmatpush.msrb.mxu1 %v1750_v44  ;;  %1804 = vmatpush.msrb.mxu2 %v3677_v16  ;;  %v2012_v44 = vsub.f32 %v3746_v43, %v4116_v40  ;;  %v2007_v40 = vand.u32 4294901760, %v2006_v28  ;;  %v2018_v28 = vsub.f32 %v3775_v61, %v4121_v46  ;;  %v869_v46 = vmax.f32 %v864_v39, 0.0 }
  0xe7   :  { %1642 = vmatpush.msrb.mxu0 %v3594_v29  ;;  %1842 = vmatpush.msrb.mxu3 %v3635_v51 }
  0xe8   :  { %1757 = vmatpush.msrb.mxu1 %v1756_v59  ;;  %1807 = vmatpush.msrb.mxu2 %v3692_v12  ;;  %v3807_v59 = vand.u32 4294901760, %v920_v31 }
  0xe9   :  { %1644 = vmatpush.msrb.mxu0 %v3620_v53  ;;  %1844 = vmatpush.msrb.mxu3 %v3651_v13 }
  0xea   :  { %1926 = vmatpush.msra.mxu1 %v3450_v22  ;;  %1810 = vmatpush.msrb.mxu2 %v3702_v0  ;;  %v2013_v22 = vand.u32 4294901760, %v2012_v44  ;;  %v3832_v52 = vsub.f32 %v920_v31, %v3807_v59  ;;  %v2024_v44 = vsub.f32 %v3790_v55, %v2023_v32  ;;  %v3844_v31 = vsub.f32 %v919_v56, %v3821_v17 }
  0xeb   :  { %1646 = vmatpush.msrb.mxu0 %v3635_v51  ;;  %1846 = vmatpush.msrb.mxu3 %v3666_v60  ;;  %v933_v56 = vsel %vm931_vm3, %v869_v46, 0  ;;  %v4138_v46 = vand.u32 4294901760, %v3484_v3 }
  0xec   :  { %1928 = vmatpush.msra.mxu1 %v3457_v62  ;;  %1970 = vmatpush.msra.mxu2 %v3714_v50  ;;  %v1657_v62 = vand.u32 4294901760, %v1656_v5  ;;  %v2041_v39 = vand.u32 4294901760, %v3832_v52  ;;  %v3854_v5 = vsub.f32 %v918_v2, %v3834_v37 }
  0xed   :  { %1648 = vmatpush.msrb.mxu0 %v3651_v13  ;;  %1848 = vmatpush.msrb.mxu3 %v3679_v10 }
  0xee   :  { %1930 = vmatpush.msra.mxu1 %v3475_v42  ;;  %1972 = vmatpush.msra.mxu2 %v3723_v26  ;;  %v2019_v42 = vand.u32 4294901760, %v2018_v28  ;;  %v3873_v28 = vand.u32 4294901760, %v933_v56 }
  0xef   :  { %2008 = vmatpush.msra.mxu3 %v2007_v40  ;;  %1650 = vmatpush.msrb.mxu0 %v3666_v60  ;;  %v2030_v40 = vsub.f32 %v3805_v1, %v2029_v47 }
  0xf0   :  { %1813 = vmatmul.f32.vlgmr.msrb.gmra.mxu2 %v3756_v7  ;;  %1932 = vmatpush.msra.mxu1 %v3495_v11  ;;  %v2025_v11 = vand.u32 4294901760, %v2024_v44  ;;  %v2036_v7 = vsub.f32 %v3819_v19, %v2035_v18  ;;  %v1988_v44 = vsub.f32 %v933_v56, %v3873_v28  ;;  %v4142_v56 = vand.u32 4294901760, %v3555_v58 }
  0xf1   :  { %1974 = vmatpush.msra.mxu2 %v3753_v54  ;;  %2014 = vmatpush.msra.mxu3 %v2013_v22  ;;  %v2047_v22 = vand.u32 4294901760, %v3844_v31  ;;  %v2031_v2 = vand.u32 4294901760, %v2030_v40  ;;  %v4145_v58 = vand.u32 4294901760, %v3604_v49  ;;  %v4150_v49 = vand.u32 4294901760, %v3677_v16 }
  0xf2   :  { %1652 = vmatpush.msrb.mxu0 %v3679_v10  ;;  %1852 = vmatmul.f32.vlgmr.msrb.gmra.mxu3 %v1655_v24  ;;  %v2053_v24 = vand.u32 4294901760, %v3854_v5  ;;  %v2037_v6 = vand.u32 4294901760, %v2036_v7 }
  0xf3   :  { %1658 = vmatmul.f32.vlgmr.msrb.gmra.mxu0 %v1657_v62  ;;  %1934 = vmatpush.msra.mxu1 %v3508_v25  ;;  %v2042_v25 = vsub.f32 %v3832_v52, %v2041_v39  ;;  %v4139_v62 = vand.u32 4294901760, %v3499_v15 }
  0xf4   :  { %1859 = vmatpush.msra.mxu0 %v1664_v4  ;;  %1976 = vmatpush.msra.mxu2 %v3765_v38  ;;  %v2048_v4 = vsub.f32 %v3844_v31, %v2047_v22 }
  0xf5   :  { %2020 = vmatpush.msra.mxu3 %v2019_v42  ;;  %1759 = vmatmul.f32.vlgmr.msrb.gmra.mxu1 %v3728_v27  ;;  %v2043_v3 = vand.u32 4294901760, %v2042_v25  ;;  %v4140_v42 = vand.u32 4294901760, %v3522_v35  ;;  %v4143_v35 = vand.u32 4294901760, %v3567_v21 }
  0xf6   :  { %1863 = vmatpush.msra.mxu0 %v4138_v46  ;;  %1936 = vmatpush.msra.mxu1 %v3524_v34  ;;  %v2054_v34 = vsub.f32 %v3854_v5, %v2053_v24  ;;  %v2049_v15 = vand.u32 4294901760, %v2048_v4 }
  0xf7   :  { %1978 = vmatpush.msra.mxu2 %v3777_v8  ;;  %2026 = vmatpush.msra.mxu3 %v2025_v11  ;;  %v1989_v11 = vand.u32 4294901760, %v1988_v44 }
  0xf8   :  { %1867 = vmatpush.msra.mxu0 %v4139_v62  ;;  %1938 = vmatpush.msra.mxu1 %v3533_v9  ;;  %v4141_v9 = vand.u32 4294901760, %v3541_v23  ;;  %v2055_v40 = vand.u32 4294901760, %v2054_v34  ;;  %v2215_v62 = vld [vmem:[%s4087_s5 + $0x10] sm:$0xff] }
  0xf9   :  { %1980 = vmatpush.msra.mxu2 %v3792_v41  ;;  %2032 = vmatpush.msra.mxu3 %v2031_v2  ;;  %v1990_v23 = vsub.f32 %v1988_v44, %v1989_v11  ;;  %v2216_v2 = vld [vmem:[%s4087_s5 + $0x18] sm:$0xff] }
  0xfa   :  { %1871 = vmatpush.msra.mxu0 %v4140_v42  ;;  %1940 = vmatpush.msra.mxu1 %v3546_v20  ;;  %v4144_v20 = vand.u32 4294901760, %v3581_v45  ;;  %v4147_v45 = vand.u32 4294901760, %v3627_v33  ;;  %v4153_v33 = vand.u32 4294901760, %v3734_v30  ;;  %v4031_v4 = vand.u32 4294901760, %v2216_v2 }
  0xfb   :  { %1982 = vmatpush.msra.mxu2 %v3807_v59  ;;  %2038 = vmatpush.msra.mxu3 %v2037_v6  ;;  %v1991_v21 = vand.u32 4294901760, %v1990_v23 }
  0xfc   :  { %1875 = vmatpush.msra.mxu0 %v4141_v9  ;;  %1942 = vmatpush.msra.mxu1 %v3572_v63  ;;  %v4146_v63 = vand.u32 4294901760, %v3610_v48  ;;  %v4151_v48 = vand.u32 4294901760, %v3692_v12  ;;  %v2214_v9 = vld [vmem:[%s4087_s5 + $0x8] sm:$0xff] }
  0xfd   :  { %1984 = vmatpush.msra.mxu2 %v3821_v17  ;;  %2044 = vmatpush.msra.mxu3 %v2043_v3 }
  0xfe   :  { %1879 = vmatpush.msra.mxu0 %v4142_v56  ;;  %1944 = vmatpush.msra.mxu1 %v3583_v14  ;;  %v4148_v14 = vand.u32 4294901760, %v3649_v36  ;;  %v4155_v36 = vand.u32 4294901760, %v3775_v61 }
  0xff   :  { %1986 = vmatpush.msra.mxu2 %v3834_v37  ;;  %2050 = vmatpush.msra.mxu3 %v2049_v15  ;;  %v2295_v15 = vsub.f32 %v2216_v2, %v4031_v4 }
 0x100   :  { %1883 = vmatpush.msra.mxu0 %v4143_v35  ;;  %1946 = vmatpush.msra.mxu1 %v3594_v29  ;;  %v4149_v29 = vand.u32 4294901760, %v3664_v57  ;;  %v4051_v35 = vand.u32 4294901760, %v2214_v9 }
 0x101   :  { %2071 = vmatpush.msrb.mxu2 %v3734_v30  ;;  %2056 = vmatpush.msra.mxu3 %v2055_v40 }
 0x102   :  { %1887 = vmatpush.msra.mxu0 %v4144_v20  ;;  %1948 = vmatpush.msra.mxu1 %v3620_v53  ;;  %v4152_v53 = vand.u32 4294901760, %v3702_v0 }
 0x103   :  { %2074 = vmatpush.msrb.mxu2 %v3746_v43  ;;  %2110 = vmatpush.msrb.mxu3 %v3714_v50 }
 0x104   :  { %1891 = vmatpush.msra.mxu0 %v4145_v58  ;;  %1950 = vmatpush.msra.mxu1 %v3635_v51  ;;  %v4154_v51 = vand.u32 4294901760, %v3746_v43  ;;  %v2296_v58 = vand.u32 4294901760, %v2295_v15 }
 0x105   :  { %2077 = vmatpush.msrb.mxu2 %v3775_v61  ;;  %2112 = vmatpush.msrb.mxu3 %v3723_v26 }
 0x106   :  { %1895 = vmatpush.msra.mxu0 %v4146_v63  ;;  %1952 = vmatpush.msra.mxu1 %v3651_v13 }
 0x107   :  { %2080 = vmatpush.msrb.mxu2 %v3790_v55  ;;  %2114 = vmatpush.msrb.mxu3 %v3753_v54 }
 0x108   :  { %1899 = vmatpush.msra.mxu0 %v4147_v45  ;;  %1954 = vmatpush.msra.mxu1 %v3666_v60  ;;  %v2307_v45 = vsub.f32 %v2214_v9, %v4051_v35 }
 0x109   :  { %2083 = vmatpush.msrb.mxu2 %v3805_v1  ;;  %2116 = vmatpush.msrb.mxu3 %v3765_v38 }
 0x10a   :  { %1992 = vmatmul.f32.vlgmr.msra.gmra.mxu2 %v1991_v21  ;;  %1903 = vmatpush.msra.mxu0 %v4148_v14  ;;  %v2213_v21 = vld [vmem:[%s4087_s5] sm:$0xff] }
 0x10b   :  { %2118 = vmatpush.msrb.mxu3 %v3777_v8  ;;  %2086 = vmatpush.msrb.mxu2 %v3819_v19  ;;  %v2251_v14 = vand.u32 4294901760, %v2213_v21 }
 0x10c   :  { %1956 = vmatpush.msra.mxu1 %v3679_v10  ;;  %2058 = vmatmul.f32.vlgmr.msra.gmra.mxu3 %v3873_v28  ;;  %v2220_v10 = vld [vmem:[%s4087_s5 + $0x38] sm:$0xff] }
 0x10d   :  { %1958 = vmatmul.f32.vlgmr.msra.gmra.mxu1 %v3728_v27  ;;  %2089 = vmatpush.msrb.mxu2 %v3832_v52  ;;  %v2217_v52 = vld [vmem:[%s4087_s5 + $0x20] sm:$0xff] }
 0x10e   :  { %2120 = vmatpush.msrb.mxu3 %v3792_v41  ;;  %2190 = vmatpush.msrb.mxu1 %v3714_v50  ;;  %v3981_v50 = vand.u32 4294901760, %v2220_v10 }
 0x10f   :  { %1907 = vmatpush.msra.mxu0 %v4149_v29  ;;  %2092 = vmatpush.msrb.mxu2 %v3844_v31 }
 0x110   :  { %2122 = vmatpush.msrb.mxu3 %v3807_v59  ;;  %2192 = vmatpush.msrb.mxu1 %v3723_v26  ;;  %v3987_v30 = vsub.f32 %v2220_v10, %v3981_v50 }
 0x111   :  { %1911 = vmatpush.msra.mxu0 %v4150_v49  ;;  %2095 = vmatpush.msrb.mxu2 %v3854_v5  ;;  %v2297_v49 = vsub.f32 %v2295_v15, %v2296_v58 }
 0x112   :  { %2124 = vmatpush.msrb.mxu3 %v3821_v17  ;;  %2194 = vmatpush.msrb.mxu1 %v3753_v54 }
 0x113   :  { %1915 = vmatpush.msra.mxu0 %v4151_v48  ;;  %2098 = vmatmul.f32.vlgmr.msrb.gmra.mxu2 %v1988_v44  ;;  %v4041_v44 = vand.u32 4294901760, %v2215_v62 }
 0x114   :  { %2126 = vmatpush.msrb.mxu3 %v3834_v37  ;;  %2196 = vmatpush.msrb.mxu1 %v3765_v38 }
 0x115   :  { %1919 = vmatpush.msra.mxu0 %v4152_v53  ;;  %2130 = vmatmul.f32.vlgmr.msrb.gmra.mxu3 %v1989_v11  ;;  %v2301_v56 = vsub.f32 %v2215_v62, %v4041_v44 }
 0x116   :  { %1921 = vmatmul.f32.vlgmr.msra.gmra.mxu0 %v3728_v27  ;;  %2198 = vmatpush.msrb.mxu1 %v3777_v8  ;;  %v2219_v27 = vld [vmem:[%s4087_s5 + $0x30] sm:$0xff]  ;;  %v2218_v8 = vld [vmem:[%s4087_s5 + $0x28] sm:$0xff] }
 0x117   :  { %2144 = vmatpush.msrb.mxu0 %v4153_v33  ;;  %v3989_v43 = vand.u32 4294901760, %v2219_v27  ;;  %2238 = vmatpush.msra.mxu2 %v3981_v50  ;;  %v2302_v63 = vand.u32 4294901760, %v2301_v56  ;;  %v2308_v33 = vand.u32 4294901760, %v2307_v45 }
 0x118   :  { %2200 = vmatpush.msrb.mxu1 %v3792_v41 }
 0x119   :  { %2148 = vmatpush.msrb.mxu0 %v4154_v51  ;;  %2240 = vmatpush.msra.mxu2 %v3989_v43  ;;  %v2303_v53 = vsub.f32 %v2301_v56, %v2302_v63  ;;  %v2313_v51 = vsub.f32 %v2213_v21, %v2251_v14 }
 0x11a   :  { %2202 = vmatpush.msrb.mxu1 %v3807_v59  ;;  %v2272_v59 = vand.u32 4294901760, %v3987_v30 }
 0x11b   :  { %2152 = vmatpush.msrb.mxu0 %v4155_v36 }
 0x11c   :  { %2204 = vmatpush.msrb.mxu1 %v3821_v17  ;;  %v2472_v17 = vld [vmem:[%s4086_s4] ss:$0 sm:$0xff]  ;;  %v2273_v31 = vsub.f32 %v3987_v30, %v2272_v59 }
 0x11d   :  { %2156 = vmatpush.msrb.mxu0 %v2023_v32  ;;  %v3998_v32 = vsub.f32 %v2219_v27, %v3989_v43 }
 0x11e   :  { %2206 = vmatpush.msrb.mxu1 %v3834_v37  ;;  %v2274_v25 = vand.u32 4294901760, %v2273_v31 }
 0x11f   :  { %2160 = vmatpush.msrb.mxu0 %v2029_v47  ;;  %2208 = vmatmul.f32.vlgmr.msrb.gmra.mxu1 %v3873_v28  ;;  %v4000_v47 = vand.u32 4294901760, %v2218_v8 }
 0x120   :  { %2370 = vmatpush.msra.mxu1 %v3981_v50  ;;  %2275 = vmatpush.msra.mxu3 %v2274_v25 }
 0x121   :  { %2164 = vmatpush.msrb.mxu0 %v2035_v18  ;;  %v4013_v5 = vsub.f32 %v2218_v8, %v4000_v47  ;;  %2242 = vmatpush.msra.mxu2 %v4000_v47 }
 0x122   :  { %v1078_v61 = vpop.f32.mrf.mxu1  ;;  %2372 = vmatpush.msra.mxu1 %v3989_v43 }
 0x123   :  { %2168 = vmatpush.msrb.mxu0 %v2041_v39  ;;  %v2278_v39 = vand.u32 4294901760, %v3998_v32  ;;  %v2284_v46 = vand.u32 4294901760, %v4013_v5 }
 0x124   :  { %2374 = vmatpush.msra.mxu1 %v4000_v47 }
 0x125   :  { %2172 = vmatpush.msrb.mxu0 %v2047_v22  ;;  %v4017_v22 = vand.u32 4294901760, %v2217_v52  ;;  %v2285_v34 = vsub.f32 %v4013_v5, %v2284_v46 }
 0x127   :  { %2176 = vmatpush.msrb.mxu0 %v2053_v24  ;;  %v2279_v24 = vsub.f32 %v3998_v32, %v2278_v39  ;;  %v4029_v6 = vsub.f32 %v2217_v52, %v4017_v22  ;;  %2244 = vmatpush.msra.mxu2 %v4017_v22  ;;  %v2286_v11 = vand.u32 4294901760, %v2285_v34 }
 0x128   :  { %2178 = vmatmul.f32.vlgmr.msrb.gmra.mxu0 %v3873_v28  ;;  %2376 = vmatpush.msra.mxu1 %v4017_v22 }
 0x129   :  { %2333 = vmatpush.msra.mxu0 %v3987_v30  ;;  %v2280_v3 = vand.u32 4294901760, %v2279_v24  ;;  %v2290_v42 = vand.u32 4294901760, %v4029_v6  ;;  %2246 = vmatpush.msra.mxu2 %v4031_v4 }
 0x12a   :  { %v977_v41 = vpop.f32.mrf.mxu0  ;;  %v1132_v18 = vpop.f32.mrf.mxu2  ;;  %2378 = vmatpush.msra.mxu1 %v4031_v4 }
 0x12b   :  { %v978_v55 = vadd.f32 %v2472_v17, %v977_v41  ;;  %v1277_v12 = vpop.f32.mrf.mxu1  ;;  %2336 = vmatpush.msra.mxu0 %v3998_v32  ;;  %2281 = vmatpush.msra.mxu3 %v2280_v3  ;;  %v2291_v20 = vsub.f32 %v4029_v6, %v2290_v42  ;;  %v2298_v17 = vand.u32 4294901760, %v2297_v49  ;;  %v2304_v41 = vand.u32 4294901760, %v2303_v53  ;;  %v2473_v3 = vld [vmem:[%s4088_s6] ss:$0 sm:$0xff] }
 0x12c   :  { %v1171_v57 = vpop.f32.mrf.mxu3  ;;  %2248 = vmatpush.msra.mxu2 %v4041_v44  ;;  %2380 = vmatpush.msra.mxu1 %v4041_v44 }
 0x12d   :  { %v1079_v19 = vadd.f32 %v1078_v61, %v978_v55  ;;  %2339 = vmatpush.msra.mxu0 %v4013_v5  ;;  %2287 = vmatpush.msra.mxu3 %v2286_v11  ;;  %v2292_v29 = vand.u32 4294901760, %v2291_v20  ;;  %v2309_v55 = vsub.f32 %v2307_v45, %v2308_v33  ;;  %v2314_v61 = vand.u32 4294901760, %v2313_v51 }
 0x12e   :  { %2250 = vmatpush.msra.mxu2 %v4051_v35  ;;  %2382 = vmatpush.msra.mxu1 %v4051_v35 }
 0x12f   :  { %v1133_v13 = vadd.f32 %v1132_v18, %v1079_v19  ;;  %2342 = vmatpush.msra.mxu0 %v4029_v6  ;;  %2293 = vmatpush.msra.mxu3 %v2292_v29 }
 0x130   :  { %2252 = vmatpush.msra.mxu2 %v2251_v14  ;;  %2384 = vmatpush.msra.mxu1 %v2251_v14 }
 0x131   :  { %v1172_v60 = vadd.f32 %v1171_v57, %v1133_v13  ;;  %2345 = vmatpush.msra.mxu0 %v2295_v15  ;;  %2299 = vmatpush.msra.mxu3 %v2298_v17  ;;  %v2310_v13 = vand.u32 4294901760, %v2309_v55  ;;  %v2315_v57 = vsub.f32 %v2313_v51, %v2314_v61 }
 0x132   :  { %2403 = vmatpush.msrb.mxu2 %v2272_v59 }
 0x133   :  { %v1240_v38 = vpop.f32.mrf.mxu0  ;;  %2348 = vmatpush.msra.mxu0 %v2301_v56  ;;  %2305 = vmatpush.msra.mxu3 %v2304_v41 }
 0x134   :  { %v1241_v16 = vadd.f32 %v1240_v38, %v1172_v60  ;;  %v2316_v38 = vand.u32 4294901760, %v2315_v57  ;;  %2407 = vmatpush.msrb.mxu2 %v2278_v39 }
 0x135   :  { %2351 = vmatpush.msra.mxu0 %v2307_v45  ;;  %2311 = vmatpush.msra.mxu3 %v2310_v13 }
 0x136   :  { %v1278_v26 = vadd.f32 %v1277_v12, %v1241_v16  ;;  %2411 = vmatpush.msrb.mxu2 %v2284_v46 }
 0x137   :  { %2354 = vmatpush.msra.mxu0 %v2313_v51  ;;  %2317 = vmatpush.msra.mxu3 %v2316_v38 }
 0x138   :  { %2415 = vmatpush.msrb.mxu2 %v2290_v42 }
 0x139   :  { %2446 = vmatpush.msrb.mxu3 %v3981_v50 }
 0x13a   :  { %2419 = vmatpush.msrb.mxu2 %v2296_v58 }
 0x13b   :  { %2448 = vmatpush.msrb.mxu3 %v3989_v43 }
 0x13c   :  { %2423 = vmatpush.msrb.mxu2 %v2302_v63 }
 0x13d   :  { %2450 = vmatpush.msrb.mxu3 %v4000_v47 }
 0x13e   :  { %2427 = vmatpush.msrb.mxu2 %v2308_v33 }
 0x13f   :  { %2452 = vmatpush.msrb.mxu3 %v4017_v22 }
 0x140   :  { %v1318_v0 = vpop.f32.mrf.mxu2  ;;  %2431 = vmatpush.msrb.mxu2 %v2314_v61 }
 0x141   :  { %v1319_v54 = vadd.f32 %v1318_v0, %v1278_v26  ;;  %2454 = vmatpush.msrb.mxu3 %v4031_v4 }
 0x143   :  { %v1419_v1 = vpop.f32.mrf.mxu3  ;;  %2456 = vmatpush.msrb.mxu3 %v4041_v44 }
 0x144   :  { %v1420_v7 = vadd.f32 %v1419_v1, %v1319_v54 }
 0x145   :  { %2458 = vmatpush.msrb.mxu3 %v4051_v35 }
 0x147   :  { %2460 = vmatpush.msrb.mxu3 %v2251_v14 }
 0x14c   :  { %v1512_v40 = vpop.f32.mrf.mxu1 }
 0x14f   :  { %v1473_v37 = vpop.f32.mrf.mxu0  ;;  %v1581_v48 = vpop.f32.mrf.mxu2 }
 0x150   :  { %v1474_v28 = vadd.f32 %v1473_v37, %v1420_v7  ;;  %v1618_v19 = vpop.f32.mrf.mxu3 }
 0x152   :  { %v1513_v23 = vadd.f32 %v1512_v40, %v1474_v28 }
 0x154   :  { %v1582_v36 = vadd.f32 %v1581_v48, %v1513_v23 }
 0x156   :  { %v1619_v60 = vadd.f32 %v1618_v19, %v1582_v36 }
 0x170   :  { %v1659_v18 = vpop.f32.mrf.mxu0 }
 0x171   :  { %v1660_v16 = vadd.f32 %v1659_v18, %v1619_v60 }
 0x172   :  { %v1760_v10 = vpop.f32.mrf.mxu1 }
 0x173   :  { %v1761_v12 = vadd.f32 %v1760_v10, %v1660_v16  ;;  %v1814_v0 = vpop.f32.mrf.mxu2 }
 0x175   :  { %v1815_v26 = vadd.f32 %v1814_v0, %v1761_v12  ;;  %v1853_v27 = vpop.f32.mrf.mxu3 }
 0x177   :  { %v1854_v30 = vadd.f32 %v1853_v27, %v1815_v26 }
 0x18a   :  { %v1959_v8 = vpop.f32.mrf.mxu1 }
 0x18d   :  { %v1993_v1 = vpop.f32.mrf.mxu2 }
 0x18f   :  { %v2059_v32 = vpop.f32.mrf.mxu3 }
 0x193   :  { %v1922_v54 = vpop.f32.mrf.mxu0 }
 0x194   :  { %v1923_v50 = vadd.f32 %v1922_v54, %v1854_v30 }
 0x196   :  { %v1960_v43 = vadd.f32 %v1959_v8, %v1923_v50  ;;  %v2099_v52 = vpop.f32.mrf.mxu2 }
 0x198   :  { %v1994_v59 = vadd.f32 %v1993_v1, %v1960_v43  ;;  %v2131_v31 = vpop.f32.mrf.mxu3 }
 0x19a   :  { %v2060_v47 = vadd.f32 %v2059_v32, %v1994_v59 }
 0x19c   :  { %v2100_v37 = vadd.f32 %v2099_v52, %v2060_v47  ;;  %v2209_v22 = vpop.f32.mrf.mxu1 }
 0x19e   :  { %v2132_v39 = vadd.f32 %v2131_v31, %v2100_v37 }
 0x1a5   :  { %v2179_v5 = vpop.f32.mrf.mxu0 }
 0x1a6   :  { %v2180_v7 = vadd.f32 %v2179_v5, %v2132_v39 }
 0x1a8   :  { %v2210_v2 = vadd.f32 %v2209_v22, %v2180_v7 }
 0x1aa   :  { %v2212_v25 = vmax.f32 %v2210_v2, 0.0 }
 0x1ac   :  { %v2227_v24 = vsel %vm2225_vm4, %v2212_v25, 0 }
 0x1ad   :  { %v2253_v46 = vand.u32 4294901760, %v2227_v24 }
 0x1af   :  { %v2254_v28 = vsub.f32 %v2227_v24, %v2253_v46  ;;  %2319 = vmatmul.f32.vlgmr.msra.gmra.mxu3 %v2253_v46 }
 0x1b1   :  { %2357 = vmatmul.f32.vlgmr.msra.gmra.mxu0 %v2254_v28  ;;  %v2255_v6 = vand.u32 4294901760, %v2254_v28 }
 0x1b3   :  { %2388 = vmatmul.f32.vlgmr.msra.gmra.mxu1 %v2255_v6  ;;  %v2256_v4 = vsub.f32 %v2254_v28, %v2255_v6 }
 0x1b5   :  { %v2257_v62 = vand.u32 4294901760, %v2256_v4 }
 0x1b7   :  { %2258 = vmatmul.f32.vlgmr.msra.gmra.mxu2 %v2257_v62  ;;  %2462 = vmatmul.f32.vlgmr.msrb.gmra.mxu3 %v2253_v46 }
 0x1bf   :  { %2433 = vmatmul.f32.vlgmr.msrb.gmra.mxu2 %v2253_v46 }
 0x22e   :  { %v2358_v9 = vpop.f32.mrf.mxu0 }
 0x230   :  { %v2389_v11 = vpop.f32.mrf.mxu1 }
 0x232   :  { %v2320_v34 = vpop.f32.mrf.mxu3 }
 0x23a   :  { %v2259_v44 = vpop.f32.mrf.mxu2  ;;  %v2463_v20 = vpop.f32.mrf.mxu3 }
 0x23b   :  { %v2260_v42 = vadd.f32 %v2473_v3, %v2259_v44 }
 0x23d   :  { %v2321_v15 = vadd.f32 %v2320_v34, %v2260_v42 }
 0x23f   :  { %v2359_v40 = vadd.f32 %v2358_v9, %v2321_v15 }
 0x241   :  { %v2390_v56 = vadd.f32 %v2389_v11, %v2359_v40 }
 0x242   :  { %v2434_v35 = vpop.f32.mrf.mxu2 }
 0x243   :  { %v2435_v23 = vadd.f32 %v2434_v35, %v2390_v56 }
 0x245   :  { %v2464_v58 = vadd.f32 %v2463_v20, %v2435_v23 }
 0x247   :  { %2467 = vst.msk [vmem:[%s4089_s7] sm:$0xff] %vm2466_vm5, %v2464_v58 }

</bundles_post_ra>
